<compile_context>
chip_gen: v7x
topology: tpu7x:2x2x1
jax: 0.10.0
libtpu: 0.0.40
codegen_flags: <defaults>
</compile_context>

<pallas_src>
import numpy as np
import jax
import jax.numpy as jnp
from jax.experimental import pallas as pl
from jax.experimental.pallas import tpu as pltpu

D = 512      # graph_hidden_dim (fixed by the module)
TILE = 256   # node-row tile (multiple of 8/16 sublanes, >= MXU edge on v6e/v7x)


def _gin_layer_kernel(a_ref, h_ref, w_ref, b_ref, out_ref, acc_ref):
    """One GINConv + ReLU: out = relu((A_hat @ H) @ W + b), tiled over source nodes."""
    @pl.when(pl.program_id(1) == 0)
    def _():
        acc_ref[...] = jnp.zeros_like(acc_ref)

    acc_ref[...] += jnp.dot(a_ref[...], h_ref[...],
                            preferred_element_type=jnp.float32)

    @pl.when(pl.program_id(1) == pl.num_programs(1) - 1)
    def _():
        lin = jnp.dot(acc_ref[...].astype(jnp.bfloat16), w_ref[...],
                      preferred_element_type=jnp.float32) + b_ref[...]
        out_ref[...] = jnp.maximum(lin, 0.0).astype(out_ref.dtype)


def _gin_final_kernel(a_ref, h_ref, w_ref, b_ref, wc_ref, s_ref, acc_ref):
    """Last GINConv + ReLU, fused with the D->1 cls projection (per-node score)."""
    @pl.when(pl.program_id(1) == 0)
    def _():
        acc_ref[...] = jnp.zeros_like(acc_ref)

    acc_ref[...] += jnp.dot(a_ref[...], h_ref[...],
                            preferred_element_type=jnp.float32)

    @pl.when(pl.program_id(1) == pl.num_programs(1) - 1)
    def _():
        lin = jnp.dot(acc_ref[...].astype(jnp.bfloat16), w_ref[...],
                      preferred_element_type=jnp.float32) + b_ref[...]
        h3 = jnp.maximum(lin, 0.0)
        # per-node cls score s_i = h3_i . wc (VPU lane reduction); this removes
        # both the [G, D] readout matmul and the MXU-hostile D->1 matmul.
        s_ref[...] = jnp.sum(h3 * wc_ref[...], axis=-1, keepdims=True)


def _readout_kernel(m_ref, s_ref, bc_ref, out_ref):
    """logits = membership @ s + bc (tiny G x N_pad product, bias from SMEM)."""
    out_ref[...] = (jnp.dot(m_ref[...], s_ref[...],
                            preferred_element_type=jnp.float32) + bc_ref[0, 0])


def _layer_call(a, h, w, b, *, n_pad, tile, wc_row=None):
    num_t = n_pad // tile
    grid = (num_t, num_t)                       # (dest tiles i, src tiles k) — k last
    a_spec = pl.BlockSpec((tile, tile), lambda i, k: (i, k))
    h_spec = pl.BlockSpec((tile, D), lambda i, k: (k, 0))
    w_spec = pl.BlockSpec((D, D), lambda i, k: (0, 0))     # resident weight
    b_spec = pl.BlockSpec((1, D), lambda i, k: (0, 0))
    cp = pltpu.CompilerParams(
        dimension_semantics=("parallel", "arbitrary"),      # i across TCs on v7x
        vmem_limit_bytes=32 * 1024 * 1024)

    if wc_row is None:
        return pl.pallas_call(
            _gin_layer_kernel,
            out_shape=jax.ShapeDtypeStruct((n_pad, D), jnp.bfloat16),
            grid_spec=pltpu.PrefetchScalarGridSpec(
                num_scalar_prefetch=0, grid=grid,
                in_specs=[a_spec, h_spec, w_spec, b_spec],
                out_specs=pl.BlockSpec((tile, D), lambda i, k: (i, 0)),
                scratch_shapes=[pltpu.VMEM((tile, D), jnp.float32)]),
            compiler_params=cp,
        )(a, h, w, b)

    wc_spec = pl.BlockSpec((1, D), lambda i, k: (0, 0))
    return pl.pallas_call(
        _gin_final_kernel,
        out_shape=jax.ShapeDtypeStruct((n_pad, 1), jnp.float32),
        grid_spec=pltpu.PrefetchScalarGridSpec(
            num_scalar_prefetch=0, grid=grid,
            in_specs=[a_spec, h_spec, w_spec, b_spec, wc_spec],
            out_specs=pl.BlockSpec((tile, 1), lambda i, k: (i, 0)),
            scratch_shapes=[pltpu.VMEM((tile, D), jnp.float32)]),
        compiler_params=cp,
    )(a, h, w, b, wc_row)


def network_forward(node_features, a_hat, membership, params, *, tile=TILE):
    """Full forward: 3x (GINConv + ReLU) -> per-graph sum readout -> Linear(512, 1)."""
    w1, b1, w2, b2, w3, b3, wc, bc = params
    n = node_features.shape[0]
    g = membership.shape[0]
    n_pad = ((n + tile - 1) // tile) * tile

    # Pad the node axis to a tile multiple. Padded nodes have zero adjacency
    # columns and zero membership, so they never affect real nodes or the readout.
    x = jnp.zeros((n_pad, D), jnp.bfloat16).at[:n, :].set(
        node_features.astype(jnp.bfloat16))
    a = jnp.zeros((n_pad, n_pad), jnp.bfloat16).at[:n, :n].set(
        a_hat.astype(jnp.bfloat16))       # small integer edge counts: exact in bf16
    m = jnp.zeros((g, n_pad), jnp.float32).at[:, :n].set(
        membership.astype(jnp.float32))

    bf = lambda t: t.astype(jnp.bfloat16)
    f32 = lambda t: t.astype(jnp.float32)
    wc_row = f32(wc).reshape(1, D)

    h = _layer_call(a, x, bf(w1), f32(b1), n_pad=n_pad, tile=tile)
    h = _layer_call(a, h, bf(w2), f32(b2), n_pad=n_pad, tile=tile)
    s = _layer_call(a, h, bf(w3), f32(b3), n_pad=n_pad, tile=tile, wc_row=wc_row)

    # logits = membership @ s + bc  (tiny; G x N_pad)
    vmem = pl.BlockSpec(memory_space=pltpu.MemorySpace.VMEM)
    smem = pl.BlockSpec(memory_space=pltpu.MemorySpace.SMEM)
    return pl.pallas_call(
        _readout_kernel,
        out_shape=jax.ShapeDtypeStruct((g, 1), jnp.float32),
        in_specs=[vmem, vmem, smem],
        out_specs=vmem,
        compiler_params=pltpu.CompilerParams(vmem_limit_bytes=32 * 1024 * 1024),
    )(m, s, f32(bc))


def reference_forward(node_features, a_hat, membership, params):
    """Pure-JAX f32 reference matching the PyTorch module's forward."""
    w1, b1, w2, b2, w3, b3, wc, bc = params
    h = node_features
    for w, b in ((w1, b1), (w2, b2), (w3, b3)):
        h = jnp.maximum((a_hat @ h) @ w + b, 0.0)
    return (membership @ h) @ wc + bc


def make_params(key):
    """Deterministic init mimicking nn.Linear default (uniform ±1/sqrt(fan_in))."""
    ks = jax.random.split(key, 8)
    bound = 1.0 / np.sqrt(D)
    u = lambda k, shape: jax.random.uniform(k, shape, jnp.float32, -bound, bound)
    w1, b1 = u(ks[0], (D, D)), u(ks[1], (1, D))
    w2, b2 = u(ks[2], (D, D)), u(ks[3], (1, D))
    w3, b3 = u(ks[4], (D, D)), u(ks[5], (1, D))
    wc, bc = u(ks[6], (D, 1)), u(ks[7], (1, 1))
    return (w1, b1, w2, b2, w3, b3, wc, bc)


if __name__ == "__main__":
    key = jax.random.PRNGKey(0)
    k_feat, k_param = jax.random.split(key)

    # Small synthetic batched graph: 2 graphs, 8 nodes each -> N = 16 nodes total.
    num_graphs, nodes_per_graph = 2, 8
    N = num_graphs * nodes_per_graph

    # Edges: a reasoning-path-like chain within each graph plus a couple of merges.
    edges = []
    for gi in range(num_graphs):
        off = gi * nodes_per_graph
        for j in range(nodes_per_graph - 1):
            edges.append((off + j, off + j + 1))             # chain src -> dst
        edges.append((off + 0, off + nodes_per_graph - 1))   # shortcut to answer node
        edges.append((off + 2, off + 5))                     # extra merge edge

    A = np.zeros((N, N), dtype=np.float32)
    for src, dst in edges:
        A[dst, src] += 1.0                                   # in-neighbour sum
    a_hat = jnp.asarray(A + np.eye(N, dtype=np.float32))     # (1 + eps) * I + A, eps = 0

    membership = np.zeros((num_graphs, N), dtype=np.float32)
    for gi in range(num_graphs):
        membership[gi, gi * nodes_per_graph:(gi + 1) * nodes_per_graph] = 1.0
    membership = jnp.asarray(membership)

    node_features = jax.random.normal(k_feat, (N, D), jnp.float32)
    params = make_params(k_param)

    logits = network_forward(node_features, a_hat, membership, params)
    logits = jax.block_until_ready(logits)

    ref = reference_forward(node_features, a_hat, membership, params)
    assert logits.shape == (num_graphs, 1)
    # bf16 MXU operands (f32 accumulation) -> loosened tolerance vs the f32 reference.
    np.testing.assert_allclose(np.asarray(logits), np.asarray(ref), rtol=1e-1, atol=1e-1)

    print("KERNEL_OK")
</pallas_src>

<mosaic_0001>
module attributes {stable_mosaic.version = 11 : i64} {
  func.func @_gin_layer_kernel(%arg0: i32, %arg1: i32, %arg2: memref<256x256xbf16, #tpu.memory_space<vmem>>, %arg3: memref<256x512xbf16, #tpu.memory_space<vmem>>, %arg4: memref<512x512xbf16, #tpu.memory_space<vmem>>, %arg5: memref<1x512xf32, #tpu.memory_space<vmem>>, %arg6: memref<256x512xbf16, #tpu.memory_space<vmem>>, %arg7: memref<256x512xf32, #tpu.memory_space<vmem>>) attributes {dimension_semantics = [#tpu.dimension_semantics<parallel>, #tpu.dimension_semantics<arbitrary>], iteration_bounds = array<i64: 1, 1>, scalar_prefetch = 0 : i64, scratch_operands = 1 : i64, tpu.core_type = #tpu.core_type<tc>, window_params = [{transform_indices = @transform_0, window_bounds = array<i64: 256, 256>}, {transform_indices = @transform_1, window_bounds = array<i64: 256, 512>}, {pipeline_mode = #tpu.pipeline_mode<synchronous>, transform_indices = @transform_2, window_bounds = array<i64: 512, 512>}, {pipeline_mode = #tpu.pipeline_mode<synchronous>, transform_indices = @transform_3, window_bounds = array<i64: 1, 512>}, {transform_indices = @transform_4, window_bounds = array<i64: 256, 512>}]} {
    %c0_i32 = arith.constant 0 : i32
    %0 = arith.cmpi eq, %arg1, %c0_i32 : i32
    %1 = arith.extui %0 : i1 to i32
    %c0_i32_0 = arith.constant 0 : i32
    %2 = arith.cmpi ne, %1, %c0_i32_0 : i32
    scf.if %2 {
      %cst_10 = arith.constant 0.000000e+00 : f32
      %12 = vector.broadcast %cst_10 : f32 to vector<256x512xf32>
      %c0_11 = arith.constant 0 : index
      %c0_12 = arith.constant 0 : index
      %13 = vector.load %arg7[%c0_11, %c0_12] : memref<256x512xf32, #tpu.memory_space<vmem>>, vector<256x512xf32>
      tpu.vector_store %arg7[%c0_11, %c0_12], %12 {strides = array<i32>} : memref<256x512xf32, #tpu.memory_space<vmem>>, vector<256x512xf32>,
    } else {
    }
    %c0 = arith.constant 0 : index
    %c0_1 = arith.constant 0 : index
    %3 = vector.load %arg7[%c0, %c0_1] : memref<256x512xf32, #tpu.memory_space<vmem>>, vector<256x512xf32>
    %c0_2 = arith.constant 0 : index
    %c0_3 = arith.constant 0 : index
    %4 = vector.load %arg2[%c0_2, %c0_3] : memref<256x256xbf16, #tpu.memory_space<vmem>>, vector<256x256xbf16>
    %c0_4 = arith.constant 0 : index
    %c0_5 = arith.constant 0 : index
    %5 = vector.load %arg3[%c0_4, %c0_5] : memref<256x512xbf16, #tpu.memory_space<vmem>>, vector<256x512xbf16>
    %cst = arith.constant dense<0.000000e+00> : vector<256x512xf32>
    %6 = tpu.matmul %4, %5, %cst {dimension_numbers = #tpu.dot_dimension_numbers<[1], [0], [0], [1], [0, 0, 1, 1], [], []>} : vector<256x256xbf16>, vector<256x512xbf16>, vector<256x512xf32> -> vector<256x512xf32>
    %7 = arith.addf %3, %6 : vector<256x512xf32>
    %c0_6 = arith.constant 0 : index
    %c0_7 = arith.constant 0 : index
    %8 = vector.load %arg7[%c0_6, %c0_7] : memref<256x512xf32, #tpu.memory_space<vmem>>, vector<256x512xf32>
    tpu.vector_store %arg7[%c0_6, %c0_7], %7 {strides = array<i32>} : memref<256x512xf32, #tpu.memory_space<vmem>>, vector<256x512xf32>,
    %c0_i32_8 = arith.constant 0 : i32
    %9 = arith.cmpi eq, %arg1, %c0_i32_8 : i32
    %10 = arith.extui %9 : i1 to i32
    %c0_i32_9 = arith.constant 0 : i32
    %11 = arith.cmpi ne, %10, %c0_i32_9 : i32
    scf.if %11 {
      %c0_10 = arith.constant 0 : index
      %c0_11 = arith.constant 0 : index
      %12 = vector.load %arg7[%c0_10, %c0_11] : memref<256x512xf32, #tpu.memory_space<vmem>>, vector<256x512xf32>
      %13 = arith.truncf %12 : vector<256x512xf32> to vector<256x512xbf16>
      %c0_12 = arith.constant 0 : index
      %c0_13 = arith.constant 0 : index
      %14 = vector.load %arg4[%c0_12, %c0_13] : memref<512x512xbf16, #tpu.memory_space<vmem>>, vector<512x512xbf16>
      %cst_14 = arith.constant dense<0.000000e+00> : vector<256x512xf32>
      %15 = tpu.matmul %13, %14, %cst_14 {dimension_numbers = #tpu.dot_dimension_numbers<[1], [0], [0], [1], [0, 0, 1, 1], [], []>} : vector<256x512xbf16>, vector<512x512xbf16>, vector<256x512xf32> -> vector<256x512xf32>
      %c0_15 = arith.constant 0 : index
      %c0_16 = arith.constant 0 : index
      %16 = vector.load %arg5[%c0_15, %c0_16] : memref<1x512xf32, #tpu.memory_space<vmem>>, vector<1x512xf32>
      %17 = vector.broadcast %16 : vector<1x512xf32> to vector<256x512xf32>
      %18 = arith.addf %15, %17 : vector<256x512xf32>
      %cst_17 = arith.constant 0.000000e+00 : f32
      %19 = vector.broadcast %cst_17 : f32 to vector<256x512xf32>
      %20 = arith.maximumf %18, %19 : vector<256x512xf32>
      %21 = arith.truncf %20 : vector<256x512xf32> to vector<256x512xbf16>
      %c0_18 = arith.constant 0 : index
      %c0_19 = arith.constant 0 : index
      %22 = vector.load %arg6[%c0_18, %c0_19] : memref<256x512xbf16, #tpu.memory_space<vmem>>, vector<256x512xbf16>
      tpu.vector_store %arg6[%c0_18, %c0_19], %21 {strides = array<i32>} : memref<256x512xbf16, #tpu.memory_space<vmem>>, vector<256x512xbf16>,
    } else {
    }
    return
  }
  func.func @transform_0(%arg0: i32, %arg1: i32) -> (i32, i32) {
    %c0_i32 = arith.constant 0 : i32
    return %arg0, %arg1 : i32, i32
  }
  func.func @transform_1(%arg0: i32, %arg1: i32) -> (i32, i32) {
    %c0_i32 = arith.constant 0 : i32
    %c0_i32_0 = arith.constant 0 : i32
    return %arg1, %c0_i32 : i32, i32
  }
  func.func @transform_2(%arg0: i32, %arg1: i32) -> (i32, i32) {
    %c0_i32 = arith.constant 0 : i32
    %c0_i32_0 = arith.constant 0 : i32
    %c0_i32_1 = arith.constant 0 : i32
    return %c0_i32, %c0_i32_0 : i32, i32
  }
  func.func @transform_3(%arg0: i32, %arg1: i32) -> (i32, i32) {
    %c0_i32 = arith.constant 0 : i32
    %c0_i32_0 = arith.constant 0 : i32
    %c0_i32_1 = arith.constant 0 : i32
    return %c0_i32, %c0_i32_0 : i32, i32
  }
  func.func @transform_4(%arg0: i32, %arg1: i32) -> (i32, i32) {
    %c0_i32 = arith.constant 0 : i32
    %c0_i32_0 = arith.constant 0 : i32
    return %arg0, %c0_i32 : i32, i32
  }
}

</mosaic_0001>

<bundles_post_ra>
// kernel: tpu_custom_call.1
= control target key start
LH: loop header
LB: loop body
LE: loop exit
PB: predicated region body
PF: predicated region fallthrough
CT: control target
= control target key end

     0   :  { %9 = vsyncpa [#allocation4], 0  ;;  %s5335_s0 = inlined_call_operand.hbm [shape: bf16[256,256], index: 0, kind: input, shape index: {}]   ;;  %s5336_s1 = inlined_call_operand.hbm [shape: bf16[256,512], index: 1, kind: input, shape index: {}]   ;;  %s5337_s2 = inlined_call_operand.hbm [shape: bf16[512,512], index: 2, kind: input, shape index: {}]   ;;  %s5338_s3 = inlined_call_operand.vmem [shape: f32[1,512], index: 3, kind: input, shape index: {}]   ;;  %s5339_s4 = inlined_call_operand.hbm [shape: bf16[256,512], index: 4, kind: output, shape index: {}]  }
   0x1   :  { %10 = vsyncpa [#allocation7], 0 }
   0x2   :  { %11 = vsyncpa [#allocation5], 0  ;;  %s4934_s15 = smov [#allocation6]   ;;  %s4840_s19 = scalar_lea.hbm %s5336_s1, 8192 }
   0x3   :  { %s29_s16 = sshll.u32 %s4934_s15, 4  ;;  %p4841_p0 = scmp.ne.s32.totalorder %s5336_s1, %s4840_s19  ;;  %s30_s16 = int_to_ptr.vmem [resolvable:$true] %s29_s16 }
   0x4   :  { %p4844_p1 = scmp.lt.u32.totalorder %s4840_s19, %s5336_s1 }
   0x6   :  { %p4846_p2 = pnand %p4844_p1, %p4841_p0 }
   0x8   :  { %4849 = shalt.err (!%p4846_p2)
}
   0x9   :  { %s4850_s24 = scalar_lea.vmem %s30_s16, 8192  ;;  %p4855_p4 = scmp.lt.s32.totalorder %s30_s16, %s30_s16 }
   0xa   :  { %p4851_p3 = scmp.ne.s32.totalorder %s30_s16, %s4850_s24  ;;  %p4856_p5 = scmp.lt.s32.totalorder %s4850_s24, %s4850_s24 }
   0xc   :  { %p4857_p6 = por %p4856_p5, %p4855_p4 }
   0xe   :  { %p4858_p7 = pnand %p4857_p6, %p4851_p3 }
  0x10   :  { %4861 = shalt.err (!%p4858_p7)
}
  0x11   :  { %s4935_s25 = smov 256   ;;  %s4936_s26 = smov 16  }
  0x12   :  { %35 = dma.hbm_to_vmem [thread:$0]  %s5336_s1, 8192, %s30_s16, [#allocation7], %s4935_s25, %s4935_s25, %s4936_s26  }
  0x13   :  { %s4937_s29 = smov [#allocation3]   ;;  %s4862_s7 = scalar_lea.hbm %s5335_s0, 4096 }
  0x14   :  { %s17_s30 = sshll.u32 %s4937_s29, 4  ;;  %p4863_p8 = scmp.ne.s32.totalorder %s5335_s0, %s4862_s7  ;;  %s18_s30 = int_to_ptr.vmem [resolvable:$true] %s17_s30 }
  0x15   :  { %p4866_p9 = scmp.lt.u32.totalorder %s4862_s7, %s5335_s0 }
  0x17   :  { %p4868_p10 = pnand %p4866_p9, %p4863_p8 }
  0x19   :  { %4871 = shalt.err (!%p4868_p10)
}
  0x1a   :  { %s4872_s12 = scalar_lea.vmem %s18_s30, 4096  ;;  %p4877_p12 = scmp.lt.s32.totalorder %s18_s30, %s18_s30 }
  0x1b   :  { %p4873_p11 = scmp.ne.s32.totalorder %s18_s30, %s4872_s12  ;;  %p4878_p13 = scmp.lt.s32.totalorder %s4872_s12, %s4872_s12 }
  0x1d   :  { %p4879_p0 = por %p4878_p13, %p4877_p12 }
  0x1f   :  { %p4880_p1 = pnand %p4879_p0, %p4873_p11 }
  0x21   :  { %4883 = shalt.err (!%p4880_p1)
}
  0x22   :  { %s4938_s1 = smov 128   ;;  %s4939_s13 = smov 8  }
  0x23   :  { %23 = dma.hbm_to_vmem [thread:$0]  %s5335_s0, 4096, %s18_s30, [#allocation4], %s4938_s1, %s4938_s1, %s4939_s13  }
  0x24   :  { %s4940_s16 = smov [#allocation8]   ;;  %s4884_s20 = scalar_lea.hbm %s5337_s2, 16384 }
  0x25   :  { %s41_s17 = sshll.u32 %s4940_s16, 4  ;;  %p4885_p2 = scmp.ne.s32.totalorder %s5337_s2, %s4884_s20  ;;  %s42_s17 = int_to_ptr.vmem [resolvable:$true] %s41_s17 }
  0x26   :  { %p4888_p3 = scmp.lt.u32.totalorder %s4884_s20, %s5337_s2 }
  0x28   :  { %p4890_p4 = pnand %p4888_p3, %p4885_p2 }
  0x2a   :  { %4893 = shalt.err (!%p4890_p4)
}
  0x2b   :  { %s4894_s27 = scalar_lea.vmem %s42_s17, 16384  ;;  %p4899_p6 = scmp.lt.s32.totalorder %s42_s17, %s42_s17 }
  0x2c   :  { %p4895_p5 = scmp.ne.s32.totalorder %s42_s17, %s4894_s27  ;;  %p4900_p7 = scmp.lt.s32.totalorder %s4894_s27, %s4894_s27 }
  0x2e   :  { %p4901_p8 = por %p4900_p7, %p4899_p6 }
  0x30   :  { %p4902_p9 = pnand %p4901_p8, %p4895_p5 }
  0x32   :  { %4905 = shalt.err (!%p4902_p9)
}
  0x33   :  { %47 = dma.hbm_to_vmem [thread:$0]  %s5337_s2, 16384, %s42_s17, [#allocation7], %s4935_s25, %s4935_s25, %s4936_s26  }
  0x34   :  { %4928 = dma.done.wait [#allocation4], 4096  }
  0x35   :  { %4929 = vsyncadd [#allocation4], 4294963200 }
  0x36   :  { %4930 = dma.done.wait [#allocation7], 24576  }
  0x37   :  { %4931 = vsyncadd [#allocation7], 4294942720  ;;  %v4504_v0 = vld [vmem:[#allocation6 + $0x4] ss:$16 sps:$4 sm:$0xff]   ;;  %v4506_v1 = vld [vmem:[#allocation6] ss:$16 sps:$4 sm:$0xff]  }
  0x38   :  { %895 = vmatprep.subr.bf16.mxu0 %v4504_v0  ;;  %v4507_v2 = vld [vmem:[#allocation6 + $0x24] ss:$16 sps:$4 sm:$0xff]   ;;  %v4509_v3 = vld [vmem:[#allocation6 + $0x20] ss:$16 sps:$4 sm:$0xff]   ;;  %v4563_v18 = vld [vmem:[#allocation6 + $0xc] ss:$16 sps:$4 sm:$0xff]  }
  0x39   :  { %896 = vmatpush1.bf16.msra.mxu0 %v4506_v1  ;;  %v4510_v4 = vld [vmem:[#allocation6 + $0x44] ss:$16 sps:$4 sm:$0xff]   ;;  %v4512_v5 = vld [vmem:[#allocation6 + $0x40] ss:$16 sps:$4 sm:$0xff]   ;;  %v4566_v19 = vld [vmem:[#allocation6 + $0x8] ss:$16 sps:$4 sm:$0xff]   ;;  %1088 = vmatprep.subr.bf16.mxu1 %v4563_v18 }
  0x3a   :  { %897 = vmatprep.subr.bf16.mxu0 %v4507_v2  ;;  %v4513_v6 = vld [vmem:[#allocation6 + $0x64] ss:$16 sps:$4 sm:$0xff]   ;;  %v4515_v7 = vld [vmem:[#allocation6 + $0x60] ss:$16 sps:$4 sm:$0xff]   ;;  %v4567_v20 = vld [vmem:[#allocation6 + $0x2c] ss:$16 sps:$4 sm:$0xff]   ;;  %1089 = vmatpush1.bf16.msra.mxu1 %v4566_v19 }
  0x3b   :  { %v4516_v8 = vld [vmem:[#allocation6 + $0x84] ss:$16 sps:$4 sm:$0xff]   ;;  %v4518_v9 = vld [vmem:[#allocation6 + $0x80] ss:$16 sps:$4 sm:$0xff]   ;;  %v4569_v21 = vld [vmem:[#allocation6 + $0x28] ss:$16 sps:$4 sm:$0xff]   ;;  %1090 = vmatprep.subr.bf16.mxu1 %v4567_v20 }
  0x3c   :  { %v4519_v10 = vld [vmem:[#allocation6 + $0xa4] ss:$16 sps:$4 sm:$0xff]   ;;  %v4521_v11 = vld [vmem:[#allocation6 + $0xa0] ss:$16 sps:$4 sm:$0xff]   ;;  %v4572_v23 = vld [vmem:[#allocation6 + $0x4c] ss:$16 sps:$4 sm:$0xff]  }
  0x3d   :  { %898 = vmatpush1.bf16.msra.mxu0 %v4509_v3  ;;  %v4522_v12 = vld [vmem:[#allocation6 + $0xc4] ss:$16 sps:$4 sm:$0xff]   ;;  %v4524_v14 = vld [vmem:[#allocation6 + $0xc0] ss:$16 sps:$4 sm:$0xff]   ;;  %v4575_v25 = vld [vmem:[#allocation6 + $0x48] ss:$16 sps:$4 sm:$0xff]  }
  0x3e   :  { %899 = vmatprep.subr.bf16.mxu0 %v4510_v4  ;;  %v4554_v13 = vld [vmem:[#allocation3 + $0x4] ss:$8 sps:$4 sm:$0xff]   ;;  %v4527_v16 = vld [vmem:[#allocation6 + $0xe0] ss:$16 sps:$4 sm:$0xff]   ;;  %1091 = vmatpush1.bf16.msra.mxu1 %v4569_v21  ;;  %v4578_v29 = vld [vmem:[#allocation6 + $0x68] ss:$16 sps:$4 sm:$0xff]  }
  0x3f   :  { %v4525_v15 = vld [vmem:[#allocation6 + $0xe4] ss:$16 sps:$4 sm:$0xff]   ;;  %927 = vmatprep.mubr.bf16.mxu0 %v4554_v13  ;;  %1120 = vmatprep.mubr.bf16.mxu1 %v4554_v13  ;;  %v4530_v22 = vld [vmem:[#allocation6 + $0x100] ss:$16 sps:$4 sm:$0xff]   ;;  %v4576_v27 = vld [vmem:[#allocation6 + $0x6c] ss:$16 sps:$4 sm:$0xff]  }
  0x40   :  { %v4528_v17 = vld [vmem:[#allocation6 + $0x104] ss:$16 sps:$4 sm:$0xff]   ;;  %v4533_v26 = vld [vmem:[#allocation6 + $0x120] ss:$16 sps:$4 sm:$0xff]   ;;  %1092 = vmatprep.subr.bf16.mxu1 %v4572_v23  ;;  %v4581_v31 = vld [vmem:[#allocation6 + $0x8c] ss:$16 sps:$4 sm:$0xff]  }
  0x41   :  { %900 = vmatpush1.bf16.msra.mxu0 %v4512_v5  ;;  %v4531_v24 = vld [vmem:[#allocation6 + $0x124] ss:$16 sps:$4 sm:$0xff]   ;;  %v4536_v30 = vld [vmem:[#allocation6 + $0x140] ss:$16 sps:$4 sm:$0xff]   ;;  %v4584_v33 = vld [vmem:[#allocation6 + $0x88] ss:$16 sps:$4 sm:$0xff]  }
  0x42   :  { %901 = vmatprep.subr.bf16.mxu0 %v4513_v6  ;;  %v4534_v28 = vld [vmem:[#allocation6 + $0x144] ss:$16 sps:$4 sm:$0xff]   ;;  %1093 = vmatpush1.bf16.msra.mxu1 %v4575_v25  ;;  %v4539_v34 = vld [vmem:[#allocation6 + $0x160] ss:$16 sps:$4 sm:$0xff]   ;;  %v4585_v35 = vld [vmem:[#allocation6 + $0xac] ss:$16 sps:$4 sm:$0xff]  }
  0x43   :  { %1094 = vmatprep.subr.bf16.mxu1 %v4576_v27  ;;  %v4537_v32 = vld [vmem:[#allocation6 + $0x164] ss:$16 sps:$4 sm:$0xff]   ;;  %v4587_v37 = vld [vmem:[#allocation6 + $0xa8] ss:$16 sps:$4 sm:$0xff]   ;;  %v4542_v38 = vld [vmem:[#allocation6 + $0x180] ss:$16 sps:$4 sm:$0xff]  }
  0x44   :  { %v4540_v36 = vld [vmem:[#allocation6 + $0x184] ss:$16 sps:$4 sm:$0xff]   ;;  %v4590_v39 = vld [vmem:[#allocation6 + $0xcc] ss:$16 sps:$4 sm:$0xff]   ;;  %v4593_v41 = vld [vmem:[#allocation6 + $0xc8] ss:$16 sps:$4 sm:$0xff]  }
  0x45   :  { %902 = vmatpush1.bf16.msra.mxu0 %v4515_v7  ;;  %v4543_v40 = vld [vmem:[#allocation6 + $0x1a4] ss:$16 sps:$4 sm:$0xff]   ;;  %v4545_v42 = vld [vmem:[#allocation6 + $0x1a0] ss:$16 sps:$4 sm:$0xff]   ;;  %v4594_v43 = vld [vmem:[#allocation6 + $0xec] ss:$16 sps:$4 sm:$0xff]  }
  0x46   :  { %903 = vmatprep.subr.bf16.mxu0 %v4516_v8  ;;  %1095 = vmatpush1.bf16.msra.mxu1 %v4578_v29  ;;  %v4546_v44 = vld [vmem:[#allocation6 + $0x1c4] ss:$16 sps:$4 sm:$0xff]   ;;  %v4596_v45 = vld [vmem:[#allocation6 + $0xe8] ss:$16 sps:$4 sm:$0xff]   ;;  %v4548_v46 = vld [vmem:[#allocation6 + $0x1c0] ss:$16 sps:$4 sm:$0xff]  }
  0x47   :  { %1096 = vmatprep.subr.bf16.mxu1 %v4581_v31  ;;  %v4599_v47 = vld [vmem:[#allocation6 + $0x10c] ss:$16 sps:$4 sm:$0xff]   ;;  %v4549_v48 = vld [vmem:[#allocation6 + $0x1e4] ss:$16 sps:$4 sm:$0xff]   ;;  %v4602_v49 = vld [vmem:[#allocation6 + $0x108] ss:$16 sps:$4 sm:$0xff]  }
  0x48   :  { %v4551_v50 = vld [vmem:[#allocation6 + $0x1e0] ss:$16 sps:$4 sm:$0xff]   ;;  %v4603_v51 = vld [vmem:[#allocation6 + $0x12c] ss:$16 sps:$4 sm:$0xff]   ;;  %v4638_v52 = vld [vmem:[#allocation8 + $0x4] ss:$16 sps:$4 sm:$0xff]  }
  0x49   :  { %904 = vmatpush1.bf16.msra.mxu0 %v4518_v9  ;;  %v5009_v53 = vld [vmem:[#allocation3] ss:$8 sps:$4 sm:$0xff]   ;;  %v5011_v55 = vld [vmem:[#allocation3 + $0x14] ss:$8 sps:$4 sm:$0xff]   ;;  %v5015_v63 = vld [vmem:[#allocation3 + $0x10] ss:$8 sps:$4 sm:$0xff]  }
  0x4a   :  { %905 = vmatprep.subr.bf16.mxu0 %v4519_v10  ;;  %1097 = vmatpush1.bf16.msra.mxu1 %v4584_v33  ;;  %v4605_v54 = vld [vmem:[#allocation6 + $0x128] ss:$16 sps:$4 sm:$0xff]   ;;  %v4608_v56 = vld [vmem:[#allocation6 + $0x14c] ss:$16 sps:$4 sm:$0xff]   ;;  %v4636_v57 = vld [vmem:[#allocation8] ss:$16 sps:$4 sm:$0xff]  }
  0x4b   :  { %1098 = vmatprep.subr.bf16.mxu1 %v4585_v35  ;;  %v4647_v58 = vld [vmem:[#allocation8 + $0x24] ss:$16 sps:$4 sm:$0xff]   ;;  %v4611_v59 = vld [vmem:[#allocation6 + $0x148] ss:$16 sps:$4 sm:$0xff]   ;;  %v4612_v60 = vld [vmem:[#allocation6 + $0x16c] ss:$16 sps:$4 sm:$0xff]  }
  0x4c   :  { %v4645_v61 = vld [vmem:[#allocation8 + $0x20] ss:$16 sps:$4 sm:$0xff]   ;;  %v4656_v62 = vld [vmem:[#allocation8 + $0x44] ss:$16 sps:$4 sm:$0xff]   ;;  %v4614_v0 = vld [vmem:[#allocation6 + $0x168] ss:$16 sps:$4 sm:$0xff]  }
  0x4d   :  { %906 = vmatpush1.bf16.msra.mxu0 %v4521_v11  ;;  %v5017_v1 = vld [vmem:[#allocation3 + $0x24] ss:$8 sps:$4 sm:$0xff]   ;;  %v4654_v3 = vld [vmem:[#allocation8 + $0x40] ss:$16 sps:$4 sm:$0xff]   ;;  %v4620_v5 = vld [vmem:[#allocation6 + $0x188] ss:$16 sps:$4 sm:$0xff]  }
  0x4e   :  { %907 = vmatprep.subr.bf16.mxu0 %v4522_v12  ;;  %1099 = vmatpush1.bf16.msra.mxu1 %v4587_v37  ;;  %v4617_v2 = vld [vmem:[#allocation6 + $0x18c] ss:$16 sps:$4 sm:$0xff]   ;;  %v4665_v4 = vld [vmem:[#allocation8 + $0x64] ss:$16 sps:$4 sm:$0xff]   ;;  %v4663_v7 = vld [vmem:[#allocation8 + $0x60] ss:$16 sps:$4 sm:$0xff]  }
  0x4f   :  { %1100 = vmatprep.subr.bf16.mxu1 %v4590_v39  ;;  %v4621_v6 = vld [vmem:[#allocation6 + $0x1ac] ss:$16 sps:$4 sm:$0xff]   ;;  %v4674_v8 = vld [vmem:[#allocation8 + $0x84] ss:$16 sps:$4 sm:$0xff]   ;;  %v5021_v9 = vld [vmem:[#allocation3 + $0x20] ss:$8 sps:$4 sm:$0xff]  }
  0x50   :  { %v4623_v10 = vld [vmem:[#allocation6 + $0x1a8] ss:$16 sps:$4 sm:$0xff]   ;;  %v5023_v11 = vld [vmem:[#allocation3 + $0x34] ss:$8 sps:$4 sm:$0xff]   ;;  %v4672_v13 = vld [vmem:[#allocation8 + $0x80] ss:$16 sps:$4 sm:$0xff]  }
  0x51   :  { %908 = vmatpush1.bf16.msra.mxu0 %v4524_v14  ;;  %v4626_v12 = vld [vmem:[#allocation6 + $0x1cc] ss:$16 sps:$4 sm:$0xff]   ;;  %v4680_v14 = vld [vmem:[#allocation8 + $0xa4] ss:$16 sps:$4 sm:$0xff]   ;;  %v5027_v19 = vld [vmem:[#allocation3 + $0x30] ss:$8 sps:$4 sm:$0xff]  }
  0x52   :  { %909 = vmatprep.subr.bf16.mxu0 %v4525_v15  ;;  %1101 = vmatpush1.bf16.msra.mxu1 %v4593_v41  ;;  %v4629_v15 = vld [vmem:[#allocation6 + $0x1c8] ss:$16 sps:$4 sm:$0xff]   ;;  %v4686_v18 = vld [vmem:[#allocation8 + $0xc4] ss:$16 sps:$4 sm:$0xff]   ;;  %v4684_v23 = vld [vmem:[#allocation8 + $0xc0] ss:$16 sps:$4 sm:$0xff]  }
  0x53   :  { %1102 = vmatprep.subr.bf16.mxu1 %v4594_v43  ;;  %v4632_v20 = vld [vmem:[#allocation6 + $0x1e8] ss:$16 sps:$4 sm:$0xff]   ;;  %v5029_v21 = vld [vmem:[#allocation3 + $0x44] ss:$8 sps:$4 sm:$0xff]   ;;  %v4690_v27 = vld [vmem:[#allocation8 + $0xe0] ss:$16 sps:$4 sm:$0xff]  }
  0x54   :  { %v4639_v25 = vld [vmem:[#allocation8 + $0x8] ss:$16 sps:$4 sm:$0xff]   ;;  %v5037_v31 = vld [vmem:[#allocation3 + $0x54] ss:$8 sps:$4 sm:$0xff]   ;;  %v4696_v33 = vld [vmem:[#allocation8 + $0x100] ss:$16 sps:$4 sm:$0xff]  }
  0x55   :  { %910 = vmatpush1.bf16.msra.mxu0 %v4527_v16  ;;  %v4630_v16 = vld [vmem:[#allocation6 + $0x1ec] ss:$16 sps:$4 sm:$0xff]   ;;  %v5034_v29 = vld [vmem:[#allocation3 + $0x40] ss:$8 sps:$4 sm:$0xff]   ;;  %v5042_v39 = vld [vmem:[#allocation3 + $0x50] ss:$8 sps:$4 sm:$0xff]  }
  0x56   :  { %911 = vmatprep.subr.bf16.mxu0 %v4528_v17  ;;  %1103 = vmatpush1.bf16.msra.mxu1 %v4596_v45  ;;  %v4678_v17 = vld [vmem:[#allocation8 + $0xa0] ss:$16 sps:$4 sm:$0xff]   ;;  %v4657_v35 = vld [vmem:[#allocation8 + $0x48] ss:$16 sps:$4 sm:$0xff]   ;;  %v5045_v41 = vld [vmem:[#allocation3 + $0x64] ss:$8 sps:$4 sm:$0xff]  }
  0x57   :  { %1104 = vmatprep.subr.bf16.mxu1 %v4599_v47  ;;  %v4702_v37 = vld [vmem:[#allocation8 + $0x120] ss:$16 sps:$4 sm:$0xff]   ;;  %v4675_v43 = vld [vmem:[#allocation8 + $0x88] ss:$16 sps:$4 sm:$0xff]   ;;  %v4716_v45 = vld [vmem:[#allocation8 + $0x164] ss:$16 sps:$4 sm:$0xff]  }
  0x58   :  { %v4714_v47 = vld [vmem:[#allocation8 + $0x160] ss:$16 sps:$4 sm:$0xff]  }
  0x59   :  { %912 = vmatpush1.bf16.msra.mxu0 %v4530_v22  ;;  %v4641_v22 = vld [vmem:[#allocation8 + $0xc] ss:$16 sps:$4 sm:$0xff]  }
  0x5a   :  { %913 = vmatprep.subr.bf16.mxu0 %v4531_v24  ;;  %1105 = vmatpush1.bf16.msra.mxu1 %v4602_v49  ;;  %v4692_v24 = vld [vmem:[#allocation8 + $0xe4] ss:$16 sps:$4 sm:$0xff]   ;;  %v5049_v49 = vld [vmem:[#allocation3 + $0x60] ss:$8 sps:$4 sm:$0xff]  }
  0x5b   :  { %1106 = vmatprep.subr.bf16.mxu1 %v4603_v51  ;;  %v5051_v51 = vld [vmem:[#allocation3 + $0x74] ss:$8 sps:$4 sm:$0xff]  }
  0x5d   :  { %914 = vmatpush1.bf16.msra.mxu0 %v4533_v26  ;;  %v4650_v26 = vld [vmem:[#allocation8 + $0x2c] ss:$16 sps:$4 sm:$0xff]  }
  0x5e   :  { %915 = vmatprep.subr.bf16.mxu0 %v4534_v28  ;;  %1107 = vmatpush1.bf16.msra.mxu1 %v4605_v54  ;;  %v4698_v28 = vld [vmem:[#allocation8 + $0x104] ss:$16 sps:$4 sm:$0xff]  }
  0x5f   :  { %1108 = vmatprep.subr.bf16.mxu1 %v4608_v56  ;;  %v4728_v54 = vld [vmem:[#allocation8 + $0x1a4] ss:$16 sps:$4 sm:$0xff]   ;;  %v4695_v56 = vld [vmem:[#allocation8 + $0xec] ss:$16 sps:$4 sm:$0xff]  }
  0x61   :  { %916 = vmatpush1.bf16.msra.mxu0 %v4536_v30  ;;  %v4648_v30 = vld [vmem:[#allocation8 + $0x28] ss:$16 sps:$4 sm:$0xff]  }
  0x62   :  { %917 = vmatprep.subr.bf16.mxu0 %v4537_v32  ;;  %1109 = vmatpush1.bf16.msra.mxu1 %v4611_v59  ;;  %v4659_v32 = vld [vmem:[#allocation8 + $0x4c] ss:$16 sps:$4 sm:$0xff]   ;;  %v5057_v59 = vld [vmem:[#allocation3 + $0x70] ss:$8 sps:$4 sm:$0xff]  }
  0x63   :  { %1110 = vmatprep.subr.bf16.mxu1 %v4612_v60  ;;  %v4693_v60 = vld [vmem:[#allocation8 + $0xe8] ss:$16 sps:$4 sm:$0xff]  }
  0x65   :  { %918 = vmatpush1.bf16.msra.mxu0 %v4539_v34  ;;  %v4704_v34 = vld [vmem:[#allocation8 + $0x124] ss:$16 sps:$4 sm:$0xff]  }
  0x66   :  { %919 = vmatprep.subr.bf16.mxu0 %v4540_v36  ;;  %1111 = vmatpush1.bf16.msra.mxu1 %v4614_v0  ;;  %v4668_v36 = vld [vmem:[#allocation8 + $0x6c] ss:$16 sps:$4 sm:$0xff]   ;;  %v4740_v0 = vld [vmem:[#allocation8 + $0x1e4] ss:$16 sps:$4 sm:$0xff]  }
  0x67   :  { %1112 = vmatprep.subr.bf16.mxu1 %v4617_v2  ;;  %v4707_v2 = vld [vmem:[#allocation8 + $0x12c] ss:$16 sps:$4 sm:$0xff]  }
  0x69   :  { %920 = vmatpush1.bf16.msra.mxu0 %v4542_v38  ;;  %v4710_v38 = vld [vmem:[#allocation8 + $0x144] ss:$16 sps:$4 sm:$0xff]  }
  0x6a   :  { %921 = vmatprep.subr.bf16.mxu0 %v4543_v40  ;;  %1113 = vmatpush1.bf16.msra.mxu1 %v4620_v5  ;;  %v4666_v40 = vld [vmem:[#allocation8 + $0x68] ss:$16 sps:$4 sm:$0xff]  }
  0x6b   :  { %1114 = vmatprep.subr.bf16.mxu1 %v4621_v6  ;;  %v4705_v5 = vld [vmem:[#allocation8 + $0x128] ss:$16 sps:$4 sm:$0xff]   ;;  %v4615_v6 = vld [vmem:[#allocation3 + $0x94] ss:$8 sps:$4 sm:$0xff]  }
  0x6d   :  { %922 = vmatpush1.bf16.msra.mxu0 %v4545_v42  ;;  %v4677_v42 = vld [vmem:[#allocation8 + $0x8c] ss:$16 sps:$4 sm:$0xff]  }
  0x6e   :  { %923 = vmatprep.subr.bf16.mxu0 %v4546_v44  ;;  %1115 = vmatpush1.bf16.msra.mxu1 %v4623_v10  ;;  %v4708_v44 = vld [vmem:[#allocation8 + $0x140] ss:$16 sps:$4 sm:$0xff]  }
  0x6f   :  { %1116 = vmatprep.subr.bf16.mxu1 %v4626_v12  ;;  %v4619_v10 = vld [vmem:[#allocation3 + $0x90] ss:$8 sps:$4 sm:$0xff]   ;;  %v4624_v12 = vld [vmem:[#allocation3 + $0xa4] ss:$8 sps:$4 sm:$0xff]  }
  0x71   :  { %924 = vmatpush1.bf16.msra.mxu0 %v4548_v46  ;;  %v4683_v46 = vld [vmem:[#allocation8 + $0xac] ss:$16 sps:$4 sm:$0xff]  }
  0x72   :  { %925 = vmatprep.subr.bf16.mxu0 %v4549_v48  ;;  %1117 = vmatpush1.bf16.msra.mxu1 %v4629_v15  ;;  %v4722_v48 = vld [vmem:[#allocation8 + $0x184] ss:$16 sps:$4 sm:$0xff]   ;;  %v4731_v15 = vld [vmem:[#allocation8 + $0x1ac] ss:$16 sps:$4 sm:$0xff]  }
  0x73   :  { %1118 = vmatprep.subr.bf16.mxu1 %v4630_v16  ;;  %v4628_v16 = vld [vmem:[#allocation3 + $0xa0] ss:$8 sps:$4 sm:$0xff]  }
  0x75   :  { %926 = vmatpush1.bf16.msra.mxu0 %v4551_v50  ;;  %v4681_v50 = vld [vmem:[#allocation8 + $0xa8] ss:$16 sps:$4 sm:$0xff]  }
  0x76   :  { %2522 = vmatprep.subr.bf16.mxu0 %v4638_v52  ;;  %1119 = vmatpush1.bf16.msra.mxu1 %v4632_v20  ;;  %v4689_v52 = vld [vmem:[#allocation8 + $0xcc] ss:$16 sps:$4 sm:$0xff]   ;;  %v4735_v20 = vld [vmem:[#allocation8 + $0x1c8] ss:$16 sps:$4 sm:$0xff]  }
  0x77   :  { %2908 = vmatprep.subr.bf16.mxu1 %v4641_v22  ;;  %v4635_v22 = vld [vmem:[#allocation3 + $0xb0] ss:$8 sps:$4 sm:$0xff]  }
  0x78   :  { %928 = vmatmul.mubr.bf16.vlgmr.msra.gmra.mrb[0].mxu0 %v5009_v53 }
  0x79   :  { %937 = vmatprep.mubr.bf16.mxu0 %v5011_v55  ;;  %2523 = vmatpush1.bf16.msra.mxu0 %v4636_v57  ;;  %v4726_v57 = vld [vmem:[#allocation8 + $0x1a0] ss:$16 sps:$4 sm:$0xff]  }
  0x7a   :  { %2524 = vmatprep.subr.bf16.mxu0 %v4647_v58  ;;  %1121 = vmatmul.mubr.bf16.vlgmr.msra.gmra.mrb[0].mxu1 %v5009_v53  ;;  %v4720_v53 = vld [vmem:[#allocation8 + $0x180] ss:$16 sps:$4 sm:$0xff]   ;;  %v4734_v58 = vld [vmem:[#allocation8 + $0x1c4] ss:$16 sps:$4 sm:$0xff]  }
  0x7b   :  { %2909 = vmatpush1.bf16.msra.mxu1 %v4639_v25  ;;  %1130 = vmatprep.mubr.bf16.mxu1 %v5011_v55  ;;  %v4687_v55 = vld [vmem:[#allocation8 + $0xc8] ss:$16 sps:$4 sm:$0xff]   ;;  %v4746_v25 = vld [vmem:[#allocation8 + $0x204] ss:$16 sps:$4 sm:$0xff]  }
  0x7c   :  { %2910 = vmatprep.subr.bf16.mxu1 %v4650_v26  ;;  %v4749_v26 = vld [vmem:[#allocation8 + $0x20c] ss:$16 sps:$4 sm:$0xff]  }
  0x7d   :  { %2525 = vmatpush1.bf16.msra.mxu0 %v4645_v61  ;;  %v5059_v61 = vld [vmem:[#allocation3 + $0x84] ss:$8 sps:$4 sm:$0xff]  }
  0x7e   :  { %2526 = vmatprep.subr.bf16.mxu0 %v4656_v62  ;;  %v4701_v62 = vld [vmem:[#allocation8 + $0x10c] ss:$16 sps:$4 sm:$0xff]  }
  0x7f   :  { %2911 = vmatpush1.bf16.msra.mxu1 %v4648_v30  ;;  %v4660_v30 = vld [vmem:[#allocation3 + $0xe4] ss:$8 sps:$4 sm:$0xff]  }
  0x80   :  { %938 = vmatmul.mubr.bf16.gmra.mrb[4].mxu0 %v5015_v63  ;;  %2912 = vmatprep.subr.bf16.mxu1 %v4659_v32  ;;  %v4669_v32 = vld [vmem:[#allocation3 + $0xf4] ss:$8 sps:$4 sm:$0xff]  }
  0x81   :  { %947 = vmatprep.mubr.bf16.mxu0 %v5017_v1  ;;  %2527 = vmatpush1.bf16.msra.mxu0 %v4654_v3  ;;  %v4738_v3 = vld [vmem:[#allocation8 + $0x1e0] ss:$16 sps:$4 sm:$0xff]  }
  0x82   :  { %2528 = vmatprep.subr.bf16.mxu0 %v4665_v4  ;;  %1131 = vmatmul.mubr.bf16.gmra.mrb[4].mxu1 %v5015_v63  ;;  %v4732_v63 = vld [vmem:[#allocation8 + $0x1c0] ss:$16 sps:$4 sm:$0xff]  }
  0x83   :  { %1140 = vmatprep.mubr.bf16.mxu1 %v5017_v1  ;;  %2913 = vmatpush1.bf16.msra.mxu1 %v4657_v35  ;;  %v4699_v1 = vld [vmem:[#allocation8 + $0x108] ss:$16 sps:$4 sm:$0xff]  }
  0x84   :  { %2914 = vmatprep.subr.bf16.mxu1 %v4668_v36  ;;  %v4610_v4 = vld [vmem:[#allocation3 + $0x80] ss:$8 sps:$4 sm:$0xff]  }
  0x85   :  { %2529 = vmatpush1.bf16.msra.mxu0 %v4663_v7  ;;  %v4713_v7 = vld [vmem:[#allocation8 + $0x14c] ss:$16 sps:$4 sm:$0xff]  }
  0x86   :  { %2530 = vmatprep.subr.bf16.mxu0 %v4674_v8  ;;  %v4711_v8 = vld [vmem:[#allocation8 + $0x148] ss:$16 sps:$4 sm:$0xff]  }
  0x87   :  { %2915 = vmatpush1.bf16.msra.mxu1 %v4666_v40  ;;  %v4744_v40 = vld [vmem:[#allocation8 + $0x200] ss:$16 sps:$4 sm:$0xff]  }
  0x88   :  { %948 = vmatmul.mubr.bf16.gmra.mrb[8].mxu0 %v5021_v9  ;;  %2916 = vmatprep.subr.bf16.mxu1 %v4677_v42  ;;  %v4752_v42 = vld [vmem:[#allocation8 + $0x224] ss:$16 sps:$4 sm:$0xff]  }
  0x89   :  { %957 = vmatprep.mubr.bf16.mxu0 %v5023_v11  ;;  %2531 = vmatpush1.bf16.msra.mxu0 %v4672_v13  ;;  %v4725_v13 = vld [vmem:[#allocation8 + $0x18c] ss:$16 sps:$4 sm:$0xff]  }
  0x8a   :  { %2532 = vmatprep.subr.bf16.mxu0 %v4680_v14  ;;  %1141 = vmatmul.mubr.bf16.gmra.mrb[8].mxu1 %v5021_v9  ;;  %v4719_v9 = vld [vmem:[#allocation8 + $0x16c] ss:$16 sps:$4 sm:$0xff]   ;;  %v4723_v14 = vld [vmem:[#allocation8 + $0x188] ss:$16 sps:$4 sm:$0xff]  }
  0x8b   :  { %1150 = vmatprep.mubr.bf16.mxu1 %v5023_v11  ;;  %2917 = vmatpush1.bf16.msra.mxu1 %v4675_v43  ;;  %v4717_v11 = vld [vmem:[#allocation8 + $0x168] ss:$16 sps:$4 sm:$0xff]   ;;  %v4755_v43 = vld [vmem:[#allocation8 + $0x22c] ss:$16 sps:$4 sm:$0xff]  }
  0x8c   :  { %2918 = vmatprep.subr.bf16.mxu1 %v4683_v46  ;;  %v4753_v46 = vld [vmem:[#allocation8 + $0x228] ss:$16 sps:$4 sm:$0xff]  }
  0x8d   :  { %2533 = vmatpush1.bf16.msra.mxu0 %v4678_v17  ;;  %v4729_v17 = vld [vmem:[#allocation8 + $0x1a8] ss:$16 sps:$4 sm:$0xff]  }
  0x8e   :  { %2534 = vmatprep.subr.bf16.mxu0 %v4686_v18  ;;  %v4633_v18 = vld [vmem:[#allocation3 + $0xb4] ss:$8 sps:$4 sm:$0xff]  }
  0x8f   :  { %2919 = vmatpush1.bf16.msra.mxu1 %v4681_v50 }
  0x90   :  { %958 = vmatmul.mubr.bf16.gmra.mrb[12].mxu0 %v5027_v19  ;;  %2920 = vmatprep.subr.bf16.mxu1 %v4689_v52 }
  0x91   :  { %967 = vmatprep.mubr.bf16.mxu0 %v5029_v21  ;;  %2535 = vmatpush1.bf16.msra.mxu0 %v4684_v23  ;;  %v4741_v23 = vld [vmem:[#allocation8 + $0x1e8] ss:$16 sps:$4 sm:$0xff]  }
  0x92   :  { %2536 = vmatprep.subr.bf16.mxu0 %v4692_v24  ;;  %1151 = vmatmul.mubr.bf16.gmra.mrb[12].mxu1 %v5027_v19  ;;  %v4737_v19 = vld [vmem:[#allocation8 + $0x1cc] ss:$16 sps:$4 sm:$0xff]  }
  0x93   :  { %1160 = vmatprep.mubr.bf16.mxu1 %v5029_v21  ;;  %2921 = vmatpush1.bf16.msra.mxu1 %v4687_v55  ;;  %v4743_v21 = vld [vmem:[#allocation8 + $0x1ec] ss:$16 sps:$4 sm:$0xff]   ;;  %v4759_v55 = vld [vmem:[#allocation8 + $0x248] ss:$16 sps:$4 sm:$0xff]  }
  0x94   :  { %2922 = vmatprep.subr.bf16.mxu1 %v4695_v56  ;;  %v4642_v24 = vld [vmem:[#allocation3 + $0xc4] ss:$8 sps:$4 sm:$0xff]  }
  0x95   :  { %2537 = vmatpush1.bf16.msra.mxu0 %v4690_v27  ;;  %v4644_v27 = vld [vmem:[#allocation3 + $0xc0] ss:$8 sps:$4 sm:$0xff]   ;;  %v4764_v56 = vld [vmem:[#allocation8 + $0x264] ss:$16 sps:$4 sm:$0xff]  }
  0x96   :  { %2538 = vmatprep.subr.bf16.mxu0 %v4698_v28  ;;  %v4651_v28 = vld [vmem:[#allocation3 + $0xd4] ss:$8 sps:$4 sm:$0xff]  }
  0x97   :  { %2923 = vmatpush1.bf16.msra.mxu1 %v4693_v60  ;;  %v4765_v60 = vld [vmem:[#allocation8 + $0x268] ss:$16 sps:$4 sm:$0xff]  }
  0x98   :  { %968 = vmatmul.mubr.bf16.gmra.mrb[16].mxu0 %v5034_v29  ;;  %2924 = vmatprep.subr.bf16.mxu1 %v4701_v62  ;;  %v4770_v62 = vld [vmem:[#allocation8 + $0x284] ss:$16 sps:$4 sm:$0xff]  }
  0x99   :  { %977 = vmatprep.mubr.bf16.mxu0 %v5037_v31  ;;  %2539 = vmatpush1.bf16.msra.mxu0 %v4696_v33  ;;  %v4671_v33 = vld [vmem:[#allocation3 + $0xf0] ss:$8 sps:$4 sm:$0xff]  }
  0x9a   :  { %2540 = vmatprep.subr.bf16.mxu0 %v4704_v34  ;;  %1161 = vmatmul.mubr.bf16.gmra.mrb[16].mxu1 %v5034_v29  ;;  %v4653_v29 = vld [vmem:[#allocation3 + $0xd0] ss:$8 sps:$4 sm:$0xff]  }
  0x9b   :  { %1170 = vmatprep.mubr.bf16.mxu1 %v5037_v31  ;;  %2925 = vmatpush1.bf16.msra.mxu1 %v4699_v1  ;;  %v4662_v31 = vld [vmem:[#allocation3 + $0xe0] ss:$8 sps:$4 sm:$0xff]  }
  0x9c   :  { %2926 = vmatprep.subr.bf16.mxu1 %v4707_v2 }
  0x9d   :  { %2541 = vmatpush1.bf16.msra.mxu0 %v4702_v37 }
  0x9e   :  { %2542 = vmatprep.subr.bf16.mxu0 %v4710_v38 }
  0x9f   :  { %2927 = vmatpush1.bf16.msra.mxu1 %v4705_v5  ;;  %v4771_v5 = vld [vmem:[#allocation8 + $0x288] ss:$16 sps:$4 sm:$0xff]  }
  0xa0   :  { %978 = vmatmul.mubr.bf16.gmra.mrb[20].mxu0 %v5042_v39  ;;  %2928 = vmatprep.subr.bf16.mxu1 %v4713_v7  ;;  %v4779_v7 = vld [vmem:[#allocation8 + $0x2ac] ss:$16 sps:$4 sm:$0xff]  }
  0xa1   :  { %987 = vmatprep.mubr.bf16.mxu0 %v5045_v41  ;;  %2543 = vmatpush1.bf16.msra.mxu0 %v4708_v44 }
  0xa2   :  { %2544 = vmatprep.subr.bf16.mxu0 %v4716_v45  ;;  %1171 = vmatmul.mubr.bf16.gmra.mrb[20].mxu1 %v5042_v39  ;;  %v4750_v45 = vld [vmem:[#allocation8 + $0x220] ss:$16 sps:$4 sm:$0xff]  }
  0xa3   :  { %1180 = vmatprep.mubr.bf16.mxu1 %v5045_v41  ;;  %2929 = vmatpush1.bf16.msra.mxu1 %v4711_v8  ;;  %v4747_v41 = vld [vmem:[#allocation8 + $0x208] ss:$16 sps:$4 sm:$0xff]  }
  0xa4   :  { %2930 = vmatprep.subr.bf16.mxu1 %v4719_v9  ;;  %v4774_v9 = vld [vmem:[#allocation8 + $0x2a0] ss:$16 sps:$4 sm:$0xff]  }
  0xa5   :  { %2545 = vmatpush1.bf16.msra.mxu0 %v4714_v47 }
  0xa6   :  { %2546 = vmatprep.subr.bf16.mxu0 %v4722_v48  ;;  %v4758_v48 = vld [vmem:[#allocation8 + $0x244] ss:$16 sps:$4 sm:$0xff]  }
  0xa7   :  { %2931 = vmatpush1.bf16.msra.mxu1 %v4717_v11 }
  0xa8   :  { %988 = vmatmul.mubr.bf16.gmra.mrb[24].mxu0 %v5049_v49  ;;  %2932 = vmatprep.subr.bf16.mxu1 %v4725_v13  ;;  %v4785_v13 = vld [vmem:[#allocation8 + $0x2cc] ss:$16 sps:$4 sm:$0xff]  }
  0xa9   :  { %997 = vmatprep.mubr.bf16.mxu0 %v5051_v51  ;;  %2547 = vmatpush1.bf16.msra.mxu0 %v4720_v53 }
  0xaa   :  { %2548 = vmatprep.subr.bf16.mxu0 %v4728_v54  ;;  %1181 = vmatmul.mubr.bf16.gmra.mrb[24].mxu1 %v5049_v49  ;;  %v4761_v49 = vld [vmem:[#allocation8 + $0x24c] ss:$16 sps:$4 sm:$0xff]   ;;  %v4756_v54 = vld [vmem:[#allocation8 + $0x240] ss:$16 sps:$4 sm:$0xff]  }
  0xab   :  { %1190 = vmatprep.mubr.bf16.mxu1 %v5051_v51  ;;  %2933 = vmatpush1.bf16.msra.mxu1 %v4723_v14 }
  0xac   :  { %2934 = vmatprep.subr.bf16.mxu1 %v4731_v15 }
  0xad   :  { %2549 = vmatpush1.bf16.msra.mxu0 %v4726_v57  ;;  %v4767_v57 = vld [vmem:[#allocation8 + $0x26c] ss:$16 sps:$4 sm:$0xff]  }
  0xae   :  { %2550 = vmatprep.subr.bf16.mxu0 %v4734_v58 }
  0xaf   :  { %2935 = vmatpush1.bf16.msra.mxu1 %v4729_v17 }
  0xb0   :  { %998 = vmatmul.mubr.bf16.gmra.mrb[28].mxu0 %v5057_v59  ;;  %2936 = vmatprep.subr.bf16.mxu1 %v4737_v19  ;;  %v4780_v19 = vld [vmem:[#allocation8 + $0x2c0] ss:$16 sps:$4 sm:$0xff]  }
  0xb1   :  { %1007 = vmatprep.mubr.bf16.mxu0 %v5059_v61  ;;  %2551 = vmatpush1.bf16.msra.mxu0 %v4732_v63  ;;  %v4773_v63 = vld [vmem:[#allocation8 + $0x28c] ss:$16 sps:$4 sm:$0xff]  }
  0xb2   :  { %2552 = vmatprep.subr.bf16.mxu0 %v4740_v0  ;;  %1191 = vmatmul.mubr.bf16.gmra.mrb[28].mxu1 %v5057_v59  ;;  %v4762_v59 = vld [vmem:[#allocation8 + $0x260] ss:$16 sps:$4 sm:$0xff]  }
  0xb3   :  { %1200 = vmatprep.mubr.bf16.mxu1 %v5059_v61  ;;  %2937 = vmatpush1.bf16.msra.mxu1 %v4735_v20  ;;  %v4783_v20 = vld [vmem:[#allocation8 + $0x2c8] ss:$16 sps:$4 sm:$0xff]  }
  0xb4   :  { %2938 = vmatprep.subr.bf16.mxu1 %v4743_v21 }
  0xb5   :  { %2553 = vmatpush1.bf16.msra.mxu0 %v4738_v3 }
  0xb6   :  { %2715 = vmatprep.subr.bf16.mxu0 %v4746_v25 }
  0xb7   :  { %2939 = vmatpush1.bf16.msra.mxu1 %v4741_v23  ;;  %v4791_v23 = vld [vmem:[#allocation8 + $0x2ec] ss:$16 sps:$4 sm:$0xff]  }
  0xb8   :  { %1008 = vmatmul.mubr.bf16.gmra.mrb[32].mxu0 %v4610_v4  ;;  %3101 = vmatprep.subr.bf16.mxu1 %v4749_v26 }
  0xb9   :  { %1017 = vmatprep.mubr.bf16.mxu0 %v4615_v6 }
  0xba   :  { %1201 = vmatmul.mubr.bf16.gmra.mrb[32].mxu1 %v4610_v4  ;;  %v4768_v4 = vld [vmem:[#allocation8 + $0x280] ss:$16 sps:$4 sm:$0xff]  }
  0xbb   :  { %1210 = vmatprep.mubr.bf16.mxu1 %v4615_v6  ;;  %v4776_v6 = vld [vmem:[#allocation8 + $0x2a4] ss:$16 sps:$4 sm:$0xff]  }
  0xc0   :  { %1018 = vmatmul.mubr.bf16.gmra.mrb[36].mxu0 %v4619_v10 }
  0xc1   :  { %1027 = vmatprep.mubr.bf16.mxu0 %v4624_v12 }
  0xc2   :  { %1211 = vmatmul.mubr.bf16.gmra.mrb[36].mxu1 %v4619_v10  ;;  %v4777_v10 = vld [vmem:[#allocation8 + $0x2a8] ss:$16 sps:$4 sm:$0xff]  }
  0xc3   :  { %1220 = vmatprep.mubr.bf16.mxu1 %v4624_v12  ;;  %v4782_v12 = vld [vmem:[#allocation8 + $0x2c4] ss:$16 sps:$4 sm:$0xff]  }
  0xc8   :  { %1028 = vmatmul.mubr.bf16.gmra.mrb[40].mxu0 %v4628_v16 }
  0xc9   :  { %1037 = vmatprep.mubr.bf16.mxu0 %v4633_v18 }
  0xca   :  { %1221 = vmatmul.mubr.bf16.gmra.mrb[40].mxu1 %v4628_v16 }
  0xcb   :  { %1230 = vmatprep.mubr.bf16.mxu1 %v4633_v18 }
  0xd0   :  { %1038 = vmatmul.mubr.bf16.gmra.mrb[44].mxu0 %v4635_v22 }
  0xd1   :  { %1047 = vmatprep.mubr.bf16.mxu0 %v4642_v24 }
  0xd2   :  { %1231 = vmatmul.mubr.bf16.gmra.mrb[44].mxu1 %v4635_v22  ;;  %v4788_v22 = vld [vmem:[#allocation8 + $0x2e4] ss:$16 sps:$4 sm:$0xff]  }
  0xd3   :  { %1240 = vmatprep.mubr.bf16.mxu1 %v4642_v24 }
  0xd8   :  { %1048 = vmatmul.mubr.bf16.gmra.mrb[48].mxu0 %v4644_v27 }
  0xd9   :  { %1057 = vmatprep.mubr.bf16.mxu0 %v4651_v28 }
  0xda   :  { %1241 = vmatmul.mubr.bf16.gmra.mrb[48].mxu1 %v4644_v27 }
  0xdb   :  { %1250 = vmatprep.mubr.bf16.mxu1 %v4651_v28 }
  0xe0   :  { %1058 = vmatmul.mubr.bf16.gmra.mrb[52].mxu0 %v4653_v29 }
  0xe1   :  { %1067 = vmatprep.mubr.bf16.mxu0 %v4660_v30 }
  0xe2   :  { %1251 = vmatmul.mubr.bf16.gmra.mrb[52].mxu1 %v4653_v29  ;;  %v4786_v29 = vld [vmem:[#allocation8 + $0x2e0] ss:$16 sps:$4 sm:$0xff]  }
  0xe3   :  { %1260 = vmatprep.mubr.bf16.mxu1 %v4660_v30  ;;  %v4789_v30 = vld [vmem:[#allocation8 + $0x2e8] ss:$16 sps:$4 sm:$0xff]  }
  0xe8   :  { %1068 = vmatmul.mubr.bf16.gmra.mrb[56].mxu0 %v4662_v31 }
  0xe9   :  { %1077 = vmatprep.mubr.bf16.mxu0 %v4669_v32 }
  0xea   :  { %1261 = vmatmul.mubr.bf16.gmra.mrb[56].mxu1 %v4662_v31 }
  0xeb   :  { %1270 = vmatprep.mubr.bf16.mxu1 %v4669_v32  ;;  %v4794_v32 = vld [vmem:[#allocation8 + $0x304] ss:$16 sps:$4 sm:$0xff]  }
  0xf0   :  { %1078 = vmatmul.mubr.bf16.gmra.mrb[60].mxu0 %v4671_v33 }
  0xf2   :  { %1271 = vmatmul.mubr.bf16.gmra.mrb[60].mxu1 %v4671_v33  ;;  %v4797_v33 = vld [vmem:[#allocation8 + $0x30c] ss:$16 sps:$4 sm:$0xff]  }
 0x14b   :  { %v929_v34 = vpop.f32.mrb[0].mxu0 }
 0x14c   :  { %v931_v35 = vpop.f32.mrb[1].mxu0 }
 0x14d   :  { %v933_v36 = vpop.f32.mrb[2].mxu0  ;;  %v1122_v17 = vpop.f32.mrb[0].mxu1 }
 0x14e   :  { %v1668_v37 = vpack.c.bf16 %v933_v36, %v929_v34  ;;  %v935_v38 = vpop.f32.mrb[3].mxu0  ;;  %v1124_v21 = vpop.f32.mrb[1].mxu1 }
 0x14f   :  { %v1669_v39 = vpack.c.bf16 %v935_v38, %v931_v35  ;;  %v1126_v24 = vpop.f32.mrb[2].mxu1 }
 0x150   :  { %v5073_v25 = vpack.c.bf16 %v1126_v24, %v1122_v17  ;;  %v1128_v26 = vpop.f32.mrb[3].mxu1 }
 0x151   :  { %2554 = vmatprep.mubr.bf16.mxu0 %v1669_v39  ;;  %2940 = vmatprep.mubr.bf16.mxu1 %v1669_v39  ;;  %v5075_v27 = vpack.c.bf16 %v1128_v26, %v1124_v21  ;;  %v4792_v39 = vld [vmem:[#allocation8 + $0x300] ss:$16 sps:$4 sm:$0xff]  }
 0x152   :  { %2555 = vmatmul.mubr.bf16.vlgmr.msra.gmra.mrb[64].mxu0 %v1668_v37  ;;  %2941 = vmatmul.mubr.bf16.vlgmr.msra.gmra.mrb[64].mxu1 %v1668_v37  ;;  %v4822_v26 = vld [vmem:[#allocation8 + $0x3a0] ss:$16 sps:$4 sm:$0xff]  }
 0x153   :  { %2716 = vmatpush1.bf16.msra.mxu0 %v4744_v40  ;;  %3102 = vmatpush1.bf16.msra.mxu1 %v4747_v41  ;;  %v939_v44 = vpop.f32.mrb[4].mxu0  ;;  %v4795_v40 = vld [vmem:[#allocation8 + $0x308] ss:$16 sps:$4 sm:$0xff]  }
 0x154   :  { %v941_v47 = vpop.f32.mrb[5].mxu0  ;;  %2717 = vmatprep.subr.bf16.mxu0 %v4752_v42  ;;  %3103 = vmatprep.subr.bf16.mxu1 %v4755_v43  ;;  %v4800_v42 = vld [vmem:[#allocation8 + $0x324] ss:$16 sps:$4 sm:$0xff]   ;;  %v4803_v43 = vld [vmem:[#allocation8 + $0x32c] ss:$16 sps:$4 sm:$0xff]  }
 0x155   :  { %v943_v50 = vpop.f32.mrb[6].mxu0  ;;  %v1132_v37 = vpop.f32.mrb[4].mxu1 }
 0x156   :  { %v1672_v51 = vpack.c.bf16 %v943_v50, %v939_v44  ;;  %v945_v52 = vpop.f32.mrb[7].mxu0  ;;  %v1134_v41 = vpop.f32.mrb[5].mxu1  ;;  %v4801_v50 = vld [vmem:[#allocation8 + $0x328] ss:$16 sps:$4 sm:$0xff]  }
 0x157   :  { %v1673_v53 = vpack.c.bf16 %v945_v52, %v941_v47  ;;  %2718 = vmatpush1.bf16.msra.mxu0 %v4750_v45  ;;  %3104 = vmatpush1.bf16.msra.mxu1 %v4753_v46  ;;  %v1136_v44 = vpop.f32.mrb[6].mxu1  ;;  %v4806_v52 = vld [vmem:[#allocation8 + $0x344] ss:$16 sps:$4 sm:$0xff]  }
 0x158   :  { %2719 = vmatprep.subr.bf16.mxu0 %v4758_v48  ;;  %3105 = vmatprep.subr.bf16.mxu1 %v4761_v49  ;;  %v5077_v45 = vpack.c.bf16 %v1136_v44, %v1132_v37  ;;  %v1138_v46 = vpop.f32.mrb[7].mxu1  ;;  %v4798_v49 = vld [vmem:[#allocation8 + $0x320] ss:$16 sps:$4 sm:$0xff]  }
 0x159   :  { %2564 = vmatprep.mubr.bf16.mxu0 %v1673_v53  ;;  %2950 = vmatprep.mubr.bf16.mxu1 %v1673_v53  ;;  %v5079_v47 = vpack.c.bf16 %v1138_v46, %v1134_v41  ;;  %v4809_v53 = vld [vmem:[#allocation8 + $0x34c] ss:$16 sps:$4 sm:$0xff]   ;;  %v4828_v37 = vld [vmem:[#allocation8 + $0x3c0] ss:$16 sps:$4 sm:$0xff]   ;;  %v4836_v41 = vld [vmem:[#allocation8 + $0x3e4] ss:$16 sps:$4 sm:$0xff]  }
 0x15a   :  { %2565 = vmatmul.mubr.bf16.gmra.mrb[68].mxu0 %v1672_v51  ;;  %2951 = vmatmul.mubr.bf16.gmra.mrb[68].mxu1 %v1672_v51 }
 0x15b   :  { %v949_v58 = vpop.f32.mrb[8].mxu0  ;;  %2720 = vmatpush1.bf16.msra.mxu0 %v4756_v54  ;;  %3106 = vmatpush1.bf16.msra.mxu1 %v4759_v55 }
 0x15c   :  { %v951_v61 = vpop.f32.mrb[9].mxu0  ;;  %2721 = vmatprep.subr.bf16.mxu0 %v4764_v56  ;;  %3107 = vmatprep.subr.bf16.mxu1 %v4767_v57 }
 0x15d   :  { %v953_v0 = vpop.f32.mrb[10].mxu0  ;;  %v1142_v57 = vpop.f32.mrb[8].mxu1 }
 0x15e   :  { %v1676_v1 = vpack.c.bf16 %v953_v0, %v949_v58  ;;  %v955_v2 = vpop.f32.mrb[11].mxu0 }
 0x15f   :  { %v1677_v3 = vpack.c.bf16 %v955_v2, %v951_v61  ;;  %2722 = vmatpush1.bf16.msra.mxu0 %v4762_v59  ;;  %3108 = vmatpush1.bf16.msra.mxu1 %v4765_v60  ;;  %v4804_v59 = vld [vmem:[#allocation8 + $0x340] ss:$16 sps:$4 sm:$0xff]   ;;  %v4807_v60 = vld [vmem:[#allocation8 + $0x348] ss:$16 sps:$4 sm:$0xff]   ;;  %v1144_v61 = vpop.f32.mrb[9].mxu1 }
 0x160   :  { %2723 = vmatprep.subr.bf16.mxu0 %v4770_v62  ;;  %3109 = vmatprep.subr.bf16.mxu1 %v4773_v63  ;;  %v4812_v62 = vld [vmem:[#allocation8 + $0x364] ss:$16 sps:$4 sm:$0xff]   ;;  %v4815_v63 = vld [vmem:[#allocation8 + $0x36c] ss:$16 sps:$4 sm:$0xff]   ;;  %v1146_v0 = vpop.f32.mrb[10].mxu1 }
 0x161   :  { %2574 = vmatprep.mubr.bf16.mxu0 %v1677_v3  ;;  %2960 = vmatprep.mubr.bf16.mxu1 %v1677_v3  ;;  %v1148_v2 = vpop.f32.mrb[11].mxu1 }
 0x162   :  { %2575 = vmatmul.mubr.bf16.gmra.mrb[72].mxu0 %v1676_v1  ;;  %2961 = vmatmul.mubr.bf16.gmra.mrb[72].mxu1 %v1676_v1  ;;  %v5081_v1 = vpack.c.bf16 %v1146_v0, %v1142_v57  ;;  %v5083_v3 = vpack.c.bf16 %v1148_v2, %v1144_v61 }
 0x163   :  { %v959_v8 = vpop.f32.mrb[12].mxu0  ;;  %2724 = vmatpush1.bf16.msra.mxu0 %v4768_v4  ;;  %3110 = vmatpush1.bf16.msra.mxu1 %v4771_v5  ;;  %v4810_v5 = vld [vmem:[#allocation8 + $0x360] ss:$16 sps:$4 sm:$0xff]  }
 0x164   :  { %v961_v11 = vpop.f32.mrb[13].mxu0  ;;  %2725 = vmatprep.subr.bf16.mxu0 %v4776_v6  ;;  %3111 = vmatprep.subr.bf16.mxu1 %v4779_v7  ;;  %v4813_v6 = vld [vmem:[#allocation8 + $0x368] ss:$16 sps:$4 sm:$0xff]  }
 0x165   :  { %v963_v14 = vpop.f32.mrb[14].mxu0 }
 0x166   :  { %v1680_v15 = vpack.c.bf16 %v963_v14, %v959_v8  ;;  %v965_v16 = vpop.f32.mrb[15].mxu0  ;;  %v4818_v8 = vld [vmem:[#allocation8 + $0x384] ss:$16 sps:$4 sm:$0xff]  }
 0x167   :  { %v1681_v18 = vpack.c.bf16 %v965_v16, %v961_v11  ;;  %2726 = vmatpush1.bf16.msra.mxu0 %v4774_v9  ;;  %3112 = vmatpush1.bf16.msra.mxu1 %v4777_v10  ;;  %v4821_v9 = vld [vmem:[#allocation8 + $0x38c] ss:$16 sps:$4 sm:$0xff]   ;;  %v4819_v16 = vld [vmem:[#allocation8 + $0x388] ss:$16 sps:$4 sm:$0xff]  }
 0x168   :  { %2727 = vmatprep.subr.bf16.mxu0 %v4782_v12  ;;  %3113 = vmatprep.subr.bf16.mxu1 %v4785_v13  ;;  %v1152_v13 = vpop.f32.mrb[12].mxu1 }
 0x169   :  { %2584 = vmatprep.mubr.bf16.mxu0 %v1681_v18  ;;  %2970 = vmatprep.mubr.bf16.mxu1 %v1681_v18  ;;  %v1154_v17 = vpop.f32.mrb[13].mxu1  ;;  %v4824_v18 = vld [vmem:[#allocation8 + $0x3a4] ss:$16 sps:$4 sm:$0xff]  }
 0x16a   :  { %2585 = vmatmul.mubr.bf16.gmra.mrb[76].mxu0 %v1680_v15  ;;  %2971 = vmatmul.mubr.bf16.gmra.mrb[76].mxu1 %v1680_v15  ;;  %v4816_v15 = vld [vmem:[#allocation8 + $0x380] ss:$16 sps:$4 sm:$0xff]  }
 0x16b   :  { %v969_v28 = vpop.f32.mrb[16].mxu0  ;;  %2728 = vmatpush1.bf16.msra.mxu0 %v4780_v19  ;;  %3114 = vmatpush1.bf16.msra.mxu1 %v4783_v20  ;;  %v4827_v19 = vld [vmem:[#allocation8 + $0x3ac] ss:$16 sps:$4 sm:$0xff]   ;;  %v1156_v20 = vpop.f32.mrb[14].mxu1 }
 0x16c   :  { %v971_v31 = vpop.f32.mrb[17].mxu0  ;;  %2729 = vmatprep.subr.bf16.mxu0 %v4788_v22  ;;  %3115 = vmatprep.subr.bf16.mxu1 %v4791_v23  ;;  %v5085_v21 = vpack.c.bf16 %v1156_v20, %v1152_v13  ;;  %v1158_v22 = vpop.f32.mrb[15].mxu1 }
 0x16d   :  { %v973_v34 = vpop.f32.mrb[18].mxu0  ;;  %v5087_v23 = vpack.c.bf16 %v1158_v22, %v1154_v17 }
 0x16e   :  { %v1684_v35 = vpack.c.bf16 %v973_v34, %v969_v28  ;;  %v975_v36 = vpop.f32.mrb[19].mxu0  ;;  %v4825_v28 = vld [vmem:[#allocation8 + $0x3a8] ss:$16 sps:$4 sm:$0xff]  }
 0x16f   :  { %v1685_v38 = vpack.c.bf16 %v975_v36, %v971_v31  ;;  %2730 = vmatpush1.bf16.msra.mxu0 %v4786_v29  ;;  %3116 = vmatpush1.bf16.msra.mxu1 %v4789_v30  ;;  %v4830_v30 = vld [vmem:[#allocation8 + $0x3c4] ss:$16 sps:$4 sm:$0xff]   ;;  %v4833_v31 = vld [vmem:[#allocation8 + $0x3cc] ss:$16 sps:$4 sm:$0xff]  }
 0x170   :  { %2731 = vmatprep.subr.bf16.mxu0 %v4794_v32  ;;  %3117 = vmatprep.subr.bf16.mxu1 %v4797_v33 }
 0x171   :  { %2594 = vmatprep.mubr.bf16.mxu0 %v1685_v38  ;;  %2980 = vmatprep.mubr.bf16.mxu1 %v1685_v38  ;;  %v4831_v38 = vld [vmem:[#allocation8 + $0x3c8] ss:$16 sps:$4 sm:$0xff]  }
 0x172   :  { %2595 = vmatmul.mubr.bf16.gmra.mrb[80].mxu0 %v1684_v35  ;;  %2981 = vmatmul.mubr.bf16.gmra.mrb[80].mxu1 %v1684_v35  ;;  %v1162_v35 = vpop.f32.mrb[16].mxu1 }
 0x173   :  { %v979_v48 = vpop.f32.mrb[20].mxu0  ;;  %2732 = vmatpush1.bf16.msra.mxu0 %v4792_v39  ;;  %3118 = vmatpush1.bf16.msra.mxu1 %v4795_v40  ;;  %v1164_v39 = vpop.f32.mrb[17].mxu1 }
 0x174   :  { %v981_v51 = vpop.f32.mrb[21].mxu0  ;;  %2733 = vmatprep.subr.bf16.mxu0 %v4800_v42  ;;  %3119 = vmatprep.subr.bf16.mxu1 %v4803_v43  ;;  %v1166_v40 = vpop.f32.mrb[18].mxu1  ;;  %v4839_v42 = vld [vmem:[#allocation8 + $0x3ec] ss:$16 sps:$4 sm:$0xff]  }
 0x175   :  { %v983_v54 = vpop.f32.mrb[22].mxu0  ;;  %v5089_v43 = vpack.c.bf16 %v1166_v40, %v1162_v35  ;;  %v1168_v44 = vpop.f32.mrb[19].mxu1 }
 0x176   :  { %v1688_v55 = vpack.c.bf16 %v983_v54, %v979_v48  ;;  %v985_v56 = vpop.f32.mrb[23].mxu0  ;;  %v5091_v46 = vpack.c.bf16 %v1168_v44, %v1164_v39 }
 0x177   :  { %v1689_v58 = vpack.c.bf16 %v985_v56, %v981_v51  ;;  %2734 = vmatpush1.bf16.msra.mxu0 %v4798_v49  ;;  %3120 = vmatpush1.bf16.msra.mxu1 %v4801_v50  ;;  %v4834_v49 = vld [vmem:[#allocation8 + $0x3e0] ss:$16 sps:$4 sm:$0xff]   ;;  %v4837_v50 = vld [vmem:[#allocation8 + $0x3e8] ss:$16 sps:$4 sm:$0xff]  }
 0x178   :  { %2735 = vmatprep.subr.bf16.mxu0 %v4806_v52  ;;  %3121 = vmatprep.subr.bf16.mxu1 %v4809_v53 }
 0x179   :  { %2604 = vmatprep.mubr.bf16.mxu0 %v1689_v58  ;;  %2990 = vmatprep.mubr.bf16.mxu1 %v1689_v58 }
 0x17a   :  { %2605 = vmatmul.mubr.bf16.gmra.mrb[84].mxu0 %v1688_v55  ;;  %2991 = vmatmul.mubr.bf16.gmra.mrb[84].mxu1 %v1688_v55  ;;  %v1172_v55 = vpop.f32.mrb[20].mxu1 }
 0x17b   :  { %v989_v4 = vpop.f32.mrb[24].mxu0  ;;  %2736 = vmatpush1.bf16.msra.mxu0 %v4804_v59  ;;  %3122 = vmatpush1.bf16.msra.mxu1 %v4807_v60  ;;  %v1174_v57 = vpop.f32.mrb[21].mxu1 }
 0x17c   :  { %v991_v7 = vpop.f32.mrb[25].mxu0  ;;  %2737 = vmatprep.subr.bf16.mxu0 %v4812_v62  ;;  %3123 = vmatprep.subr.bf16.mxu1 %v4815_v63  ;;  %v1176_v58 = vpop.f32.mrb[22].mxu1 }
 0x17d   :  { %v993_v10 = vpop.f32.mrb[26].mxu0  ;;  %v5093_v59 = vpack.c.bf16 %v1176_v58, %v1172_v55  ;;  %v1178_v60 = vpop.f32.mrb[23].mxu1 }
 0x17e   :  { %v1692_v11 = vpack.c.bf16 %v993_v10, %v989_v4  ;;  %v995_v12 = vpop.f32.mrb[27].mxu0  ;;  %v5095_v61 = vpack.c.bf16 %v1178_v60, %v1174_v57 }
 0x17f   :  { %v1693_v14 = vpack.c.bf16 %v995_v12, %v991_v7  ;;  %2738 = vmatpush1.bf16.msra.mxu0 %v4810_v5  ;;  %3124 = vmatpush1.bf16.msra.mxu1 %v4813_v6  ;;  %v1182_v5 = vpop.f32.mrb[24].mxu1 }
 0x180   :  { %2739 = vmatprep.subr.bf16.mxu0 %v4818_v8  ;;  %3125 = vmatprep.subr.bf16.mxu1 %v4821_v9  ;;  %v1184_v7 = vpop.f32.mrb[25].mxu1 }
 0x181   :  { %2614 = vmatprep.mubr.bf16.mxu0 %v1693_v14  ;;  %3000 = vmatprep.mubr.bf16.mxu1 %v1693_v14  ;;  %v1186_v8 = vpop.f32.mrb[26].mxu1 }
 0x182   :  { %2615 = vmatmul.mubr.bf16.gmra.mrb[88].mxu0 %v1692_v11  ;;  %3001 = vmatmul.mubr.bf16.gmra.mrb[88].mxu1 %v1692_v11  ;;  %v5097_v9 = vpack.c.bf16 %v1186_v8, %v1182_v5  ;;  %v1188_v10 = vpop.f32.mrb[27].mxu1 }
 0x183   :  { %v999_v24 = vpop.f32.mrb[28].mxu0  ;;  %2740 = vmatpush1.bf16.msra.mxu0 %v4816_v15  ;;  %3126 = vmatpush1.bf16.msra.mxu1 %v4819_v16  ;;  %v5099_v11 = vpack.c.bf16 %v1188_v10, %v1184_v7 }
 0x184   :  { %v1001_v29 = vpop.f32.mrb[29].mxu0  ;;  %2741 = vmatprep.subr.bf16.mxu0 %v4824_v18  ;;  %3127 = vmatprep.subr.bf16.mxu1 %v4827_v19 }
 0x185   :  { %v1003_v32 = vpop.f32.mrb[30].mxu0  ;;  %v1192_v17 = vpop.f32.mrb[28].mxu1 }
 0x186   :  { %v1696_v33 = vpack.c.bf16 %v1003_v32, %v999_v24  ;;  %v1005_v34 = vpop.f32.mrb[31].mxu0  ;;  %v1194_v19 = vpop.f32.mrb[29].mxu1 }
 0x187   :  { %v1697_v36 = vpack.c.bf16 %v1005_v34, %v1001_v29  ;;  %2742 = vmatpush1.bf16.msra.mxu0 %v4822_v26  ;;  %3128 = vmatpush1.bf16.msra.mxu1 %v4825_v28  ;;  %v1196_v20 = vpop.f32.mrb[30].mxu1 }
 0x188   :  { %2743 = vmatprep.subr.bf16.mxu0 %v4830_v30  ;;  %3129 = vmatprep.subr.bf16.mxu1 %v4833_v31  ;;  %v5101_v22 = vpack.c.bf16 %v1196_v20, %v1192_v17  ;;  %v1198_v24 = vpop.f32.mrb[31].mxu1 }
 0x189   :  { %2624 = vmatprep.mubr.bf16.mxu0 %v1697_v36  ;;  %3010 = vmatprep.mubr.bf16.mxu1 %v1697_v36  ;;  %v5103_v26 = vpack.c.bf16 %v1198_v24, %v1194_v19 }
 0x18a   :  { %2625 = vmatmul.mubr.bf16.gmra.mrb[92].mxu0 %v1696_v33  ;;  %3011 = vmatmul.mubr.bf16.gmra.mrb[92].mxu1 %v1696_v33 }
 0x18b   :  { %v1009_v48 = vpop.f32.mrb[32].mxu0  ;;  %2744 = vmatpush1.bf16.msra.mxu0 %v4828_v37  ;;  %3130 = vmatpush1.bf16.msra.mxu1 %v4831_v38 }
 0x18c   :  { %v1011_v51 = vpop.f32.mrb[33].mxu0  ;;  %2745 = vmatprep.subr.bf16.mxu0 %v4836_v41  ;;  %3131 = vmatprep.subr.bf16.mxu1 %v4839_v42 }
 0x18d   :  { %v1013_v52 = vpop.f32.mrb[34].mxu0  ;;  %v1202_v33 = vpop.f32.mrb[32].mxu1 }
 0x18e   :  { %v1700_v53 = vpack.c.bf16 %v1013_v52, %v1009_v48  ;;  %v1015_v54 = vpop.f32.mrb[35].mxu0  ;;  %v1204_v35 = vpop.f32.mrb[33].mxu1 }
 0x18f   :  { %v1701_v56 = vpack.c.bf16 %v1015_v54, %v1011_v51  ;;  %2746 = vmatpush1.bf16.msra.mxu0 %v4834_v49  ;;  %3132 = vmatpush1.bf16.msra.mxu1 %v4837_v50  ;;  %v1206_v36 = vpop.f32.mrb[34].mxu1 }
 0x190   :  { %v5105_v37 = vpack.c.bf16 %v1206_v36, %v1202_v33  ;;  %v1208_v38 = vpop.f32.mrb[35].mxu1 }
 0x191   :  { %2634 = vmatprep.mubr.bf16.mxu0 %v1701_v56  ;;  %3020 = vmatprep.mubr.bf16.mxu1 %v1701_v56  ;;  %v5107_v39 = vpack.c.bf16 %v1208_v38, %v1204_v35 }
 0x192   :  { %2635 = vmatmul.mubr.bf16.gmra.mrb[96].mxu0 %v1700_v53  ;;  %3021 = vmatmul.mubr.bf16.gmra.mrb[96].mxu1 %v1700_v53 }
 0x193   :  { %v1019_v62 = vpop.f32.mrb[36].mxu0 }
 0x194   :  { %v1021_v63 = vpop.f32.mrb[37].mxu0 }
 0x195   :  { %v1023_v0 = vpop.f32.mrb[38].mxu0  ;;  %v1212_v49 = vpop.f32.mrb[36].mxu1 }
 0x196   :  { %v1704_v2 = vpack.c.bf16 %v1023_v0, %v1019_v62  ;;  %v1025_v4 = vpop.f32.mrb[39].mxu0  ;;  %v1214_v51 = vpop.f32.mrb[37].mxu1 }
 0x197   :  { %v1705_v6 = vpack.c.bf16 %v1025_v4, %v1021_v63  ;;  %v1216_v52 = vpop.f32.mrb[38].mxu1 }
 0x198   :  { %v5109_v53 = vpack.c.bf16 %v1216_v52, %v1212_v49  ;;  %v1218_v54 = vpop.f32.mrb[39].mxu1 }
 0x199   :  { %2644 = vmatprep.mubr.bf16.mxu0 %v1705_v6  ;;  %3030 = vmatprep.mubr.bf16.mxu1 %v1705_v6  ;;  %v5111_v55 = vpack.c.bf16 %v1218_v54, %v1214_v51 }
 0x19a   :  { %2645 = vmatmul.mubr.bf16.gmra.mrb[100].mxu0 %v1704_v2  ;;  %3031 = vmatmul.mubr.bf16.gmra.mrb[100].mxu1 %v1704_v2 }
 0x19b   :  { %v1029_v12 = vpop.f32.mrb[40].mxu0 }
 0x19c   :  { %v1031_v13 = vpop.f32.mrb[41].mxu0 }
 0x19d   :  { %v1033_v14 = vpop.f32.mrb[42].mxu0  ;;  %v1222_v63 = vpop.f32.mrb[40].mxu1 }
 0x19e   :  { %v1708_v15 = vpack.c.bf16 %v1033_v14, %v1029_v12  ;;  %v1035_v16 = vpop.f32.mrb[43].mxu0  ;;  %v1224_v2 = vpop.f32.mrb[41].mxu1 }
 0x19f   :  { %v1709_v18 = vpack.c.bf16 %v1035_v16, %v1031_v13  ;;  %v1226_v4 = vpop.f32.mrb[42].mxu1 }
 0x1a0   :  { %v5113_v5 = vpack.c.bf16 %v1226_v4, %v1222_v63  ;;  %v1228_v6 = vpop.f32.mrb[43].mxu1 }
 0x1a1   :  { %2654 = vmatprep.mubr.bf16.mxu0 %v1709_v18  ;;  %3040 = vmatprep.mubr.bf16.mxu1 %v1709_v18  ;;  %v5115_v7 = vpack.c.bf16 %v1228_v6, %v1224_v2 }
 0x1a2   :  { %2655 = vmatmul.mubr.bf16.gmra.mrb[104].mxu0 %v1708_v15  ;;  %3041 = vmatmul.mubr.bf16.gmra.mrb[104].mxu1 %v1708_v15 }
 0x1a3   :  { %v1039_v28 = vpop.f32.mrb[44].mxu0 }
 0x1a4   :  { %v1041_v29 = vpop.f32.mrb[45].mxu0 }
 0x1a5   :  { %v1043_v30 = vpop.f32.mrb[46].mxu0  ;;  %v1232_v15 = vpop.f32.mrb[44].mxu1 }
 0x1a6   :  { %v1712_v31 = vpack.c.bf16 %v1043_v30, %v1039_v28  ;;  %v1045_v32 = vpop.f32.mrb[47].mxu0  ;;  %v1234_v17 = vpop.f32.mrb[45].mxu1 }
 0x1a7   :  { %v1713_v34 = vpack.c.bf16 %v1045_v32, %v1041_v29  ;;  %v1236_v18 = vpop.f32.mrb[46].mxu1 }
 0x1a8   :  { %v5117_v19 = vpack.c.bf16 %v1236_v18, %v1232_v15  ;;  %v1238_v20 = vpop.f32.mrb[47].mxu1 }
 0x1a9   :  { %2664 = vmatprep.mubr.bf16.mxu0 %v1713_v34  ;;  %3050 = vmatprep.mubr.bf16.mxu1 %v1713_v34  ;;  %v5119_v24 = vpack.c.bf16 %v1238_v20, %v1234_v17 }
 0x1aa   :  { %2665 = vmatmul.mubr.bf16.gmra.mrb[108].mxu0 %v1712_v31  ;;  %3051 = vmatmul.mubr.bf16.gmra.mrb[108].mxu1 %v1712_v31 }
 0x1ab   :  { %v1049_v40 = vpop.f32.mrb[48].mxu0 }
 0x1ac   :  { %v1051_v41 = vpop.f32.mrb[49].mxu0 }
 0x1ad   :  { %v1053_v42 = vpop.f32.mrb[50].mxu0  ;;  %v1242_v33 = vpop.f32.mrb[48].mxu1 }
 0x1ae   :  { %v1716_v44 = vpack.c.bf16 %v1053_v42, %v1049_v40  ;;  %v1055_v48 = vpop.f32.mrb[51].mxu0  ;;  %v1244_v35 = vpop.f32.mrb[49].mxu1 }
 0x1af   :  { %v1717_v50 = vpack.c.bf16 %v1055_v48, %v1051_v41  ;;  %v1246_v36 = vpop.f32.mrb[50].mxu1 }
 0x1b0   :  { %v5121_v38 = vpack.c.bf16 %v1246_v36, %v1242_v33  ;;  %v1248_v40 = vpop.f32.mrb[51].mxu1 }
 0x1b1   :  { %2674 = vmatprep.mubr.bf16.mxu0 %v1717_v50  ;;  %3060 = vmatprep.mubr.bf16.mxu1 %v1717_v50  ;;  %v5123_v41 = vpack.c.bf16 %v1248_v40, %v1244_v35 }
 0x1b2   :  { %2675 = vmatmul.mubr.bf16.gmra.mrb[112].mxu0 %v1716_v44  ;;  %3061 = vmatmul.mubr.bf16.gmra.mrb[112].mxu1 %v1716_v44 }
 0x1b3   :  { %v1059_v56 = vpop.f32.mrb[52].mxu0 }
 0x1b4   :  { %v1061_v57 = vpop.f32.mrb[53].mxu0 }
 0x1b5   :  { %v1063_v58 = vpop.f32.mrb[54].mxu0  ;;  %v1252_v42 = vpop.f32.mrb[52].mxu1 }
 0x1b6   :  { %v1720_v60 = vpack.c.bf16 %v1063_v58, %v1059_v56  ;;  %v1065_v62 = vpop.f32.mrb[55].mxu0  ;;  %v1254_v44 = vpop.f32.mrb[53].mxu1 }
 0x1b7   :  { %v1721_v0 = vpack.c.bf16 %v1065_v62, %v1061_v57  ;;  %v1256_v48 = vpop.f32.mrb[54].mxu1 }
 0x1b8   :  { %v5127_v49 = vpack.c.bf16 %v1256_v48, %v1252_v42  ;;  %v1258_v50 = vpop.f32.mrb[55].mxu1 }
 0x1b9   :  { %2684 = vmatprep.mubr.bf16.mxu0 %v1721_v0  ;;  %3070 = vmatprep.mubr.bf16.mxu1 %v1721_v0  ;;  %v1723_v51 = vpack.c.bf16 %v1258_v50, %v1254_v44 }
 0x1ba   :  { %2685 = vmatmul.mubr.bf16.gmra.mrb[116].mxu0 %v1720_v60  ;;  %3071 = vmatmul.mubr.bf16.gmra.mrb[116].mxu1 %v1720_v60 }
 0x1bb   :  { %v1069_v8 = vpop.f32.mrb[56].mxu0 }
 0x1bc   :  { %v1071_v10 = vpop.f32.mrb[57].mxu0 }
 0x1bd   :  { %v1073_v12 = vpop.f32.mrb[58].mxu0  ;;  %v1262_v52 = vpop.f32.mrb[56].mxu1 }
 0x1be   :  { %v1724_v13 = vpack.c.bf16 %v1073_v12, %v1069_v8  ;;  %v1075_v14 = vpop.f32.mrb[59].mxu0  ;;  %v1264_v54 = vpop.f32.mrb[57].mxu1 }
 0x1bf   :  { %v1725_v16 = vpack.c.bf16 %v1075_v14, %v1071_v10  ;;  %v1266_v56 = vpop.f32.mrb[58].mxu1 }
 0x1c0   :  { %v1726_v57 = vpack.c.bf16 %v1266_v56, %v1262_v52 }
 0x1c1   :  { %2694 = vmatprep.mubr.bf16.mxu0 %v1725_v16  ;;  %3080 = vmatprep.mubr.bf16.mxu1 %v1725_v16 }
 0x1c2   :  { %2695 = vmatmul.mubr.bf16.gmra.mrb[120].mxu0 %v1724_v13  ;;  %3081 = vmatmul.mubr.bf16.gmra.mrb[120].mxu1 %v1724_v13 }
 0x1c3   :  { %v1079_v28 = vpop.f32.mrb[60].mxu0 }
 0x1c4   :  { %v1081_v29 = vpop.f32.mrb[61].mxu0 }
 0x1c5   :  { %v1083_v30 = vpop.f32.mrb[62].mxu0 }
 0x1c6   :  { %v1728_v31 = vpack.c.bf16 %v1083_v30, %v1079_v28  ;;  %v1085_v32 = vpop.f32.mrb[63].mxu0 }
 0x1c7   :  { %v1729_v34 = vpack.c.bf16 %v1085_v32, %v1081_v29 }
 0x1c9   :  { %2704 = vmatprep.mubr.bf16.mxu0 %v1729_v34  ;;  %3090 = vmatprep.mubr.bf16.mxu1 %v1729_v34 }
 0x1ca   :  { %2705 = vmatmul.mubr.bf16.gmra.mrb[124].mxu0 %v1728_v31  ;;  %3091 = vmatmul.mubr.bf16.gmra.mrb[124].mxu1 %v1728_v31 }
 0x1cb   :  { %2747 = vmatprep.mubr.bf16.mxu0 %v5075_v27  ;;  %3133 = vmatprep.mubr.bf16.mxu1 %v5075_v27  ;;  %v1268_v27 = vpop.f32.mrb[59].mxu1 }
 0x1cc   :  { %v1727_v58 = vpack.c.bf16 %v1268_v27, %v1264_v54 }
 0x1d2   :  { %2748 = vmatmul.mubr.bf16.vlgmr.msra.gmra.mrb[64].mxu0 %v5073_v25  ;;  %3134 = vmatmul.mubr.bf16.vlgmr.msra.gmra.mrb[64].mxu1 %v5073_v25  ;;  %v1272_v25 = vpop.f32.mrb[60].mxu1 }
 0x1d3   :  { %2757 = vmatprep.mubr.bf16.mxu0 %v5079_v47  ;;  %3143 = vmatprep.mubr.bf16.mxu1 %v5079_v47  ;;  %v1274_v60 = vpop.f32.mrb[61].mxu1 }
 0x1d4   :  { %v1276_v62 = vpop.f32.mrb[62].mxu1 }
 0x1d5   :  { %v1730_v63 = vpack.c.bf16 %v1276_v62, %v1272_v25  ;;  %v1278_v0 = vpop.f32.mrb[63].mxu1 }
 0x1d6   :  { %v1731_v47 = vpack.c.bf16 %v1278_v0, %v1274_v60 }
 0x1da   :  { %2758 = vmatmul.mubr.bf16.gmra.mrb[68].mxu0 %v5077_v45  ;;  %3144 = vmatmul.mubr.bf16.gmra.mrb[68].mxu1 %v5077_v45  ;;  %v1862_v45 = vlaneseq }
 0x1db   :  { %2767 = vmatprep.mubr.bf16.mxu0 %v5083_v3  ;;  %3153 = vmatprep.mubr.bf16.mxu1 %v5083_v3 }
 0x1e2   :  { %2768 = vmatmul.mubr.bf16.gmra.mrb[72].mxu0 %v5081_v1  ;;  %3154 = vmatmul.mubr.bf16.gmra.mrb[72].mxu1 %v5081_v1  ;;  %v1863_v1 = vshrl.u32 %v1862_v45, 7 }
 0x1e3   :  { %2777 = vmatprep.mubr.bf16.mxu0 %v5087_v23  ;;  %3163 = vmatprep.mubr.bf16.mxu1 %v5087_v23  ;;  %v1860_v23 = vld [vmem:[%s5338_s3] sm:$0xf]  ;;  %s4941_s3 = smov [#allocation9]  }
 0x1e4   :  { %v1864_v3 = vsub.s32 0, %v1863_v1  ;;  %s3875_s30 = sshll.u32 %s4941_s3, 4  ;;  %s3876_s30 = int_to_ptr.vmem [resolvable:$true] %s3875_s30 }
 0x1e5   :  { %s4906_s5 = scalar_lea.vmem %s3876_s30, 8192  ;;  %p4911_p11 = scmp.lt.s32.totalorder %s3876_s30, %s3876_s30 }
 0x1e6   :  { %p4907_p10 = scmp.ne.s32.totalorder %s3876_s30, %s4906_s5  ;;  %p4912_p12 = scmp.lt.s32.totalorder %s4906_s5, %s4906_s5 }
 0x1e8   :  { %p4913_p13 = por %p4912_p12, %p4911_p11 }
 0x1ea   :  { %2778 = vmatmul.mubr.bf16.gmra.mrb[76].mxu0 %v5085_v21  ;;  %3164 = vmatmul.mubr.bf16.gmra.mrb[76].mxu1 %v5085_v21  ;;  %v1872_v21 = vsub.s32 2, %v1863_v1  ;;  %p4914_p0 = pnand %p4913_p13, %p4907_p10 }
 0x1eb   :  { %2787 = vmatprep.mubr.bf16.mxu0 %v5091_v46  ;;  %3173 = vmatprep.mubr.bf16.mxu1 %v5091_v46  ;;  %v1876_v46 = vsub.s32 3, %v1863_v1 }
 0x1f2   :  { %2788 = vmatmul.mubr.bf16.gmra.mrb[80].mxu0 %v5089_v43  ;;  %3174 = vmatmul.mubr.bf16.gmra.mrb[80].mxu1 %v5089_v43  ;;  %v1868_v43 = vsub.s32 1, %v1863_v1 }
 0x1f3   :  { %2797 = vmatprep.mubr.bf16.mxu0 %v5095_v61  ;;  %3183 = vmatprep.mubr.bf16.mxu1 %v5095_v61  ;;  %v5186_v61 = vrot.slane %v1860_v23, %v1872_v21 }
 0x1fa   :  { %2798 = vmatmul.mubr.bf16.gmra.mrb[84].mxu0 %v5093_v59  ;;  %3184 = vmatmul.mubr.bf16.gmra.mrb[84].mxu1 %v5093_v59  ;;  %v5184_v59 = vrot.slane %v1860_v23, %v1864_v3 }
 0x1fb   :  { %2807 = vmatprep.mubr.bf16.mxu0 %v5099_v11  ;;  %3193 = vmatprep.mubr.bf16.mxu1 %v5099_v11  ;;  %v5190_v11 = vrot.slane %v1860_v23, %v1876_v46 }
 0x202   :  { %2808 = vmatmul.mubr.bf16.gmra.mrb[88].mxu0 %v5097_v9  ;;  %3194 = vmatmul.mubr.bf16.gmra.mrb[88].mxu1 %v5097_v9  ;;  %v5188_v9 = vrot.slane %v1860_v23, %v1868_v43 }
 0x203   :  { %2817 = vmatprep.mubr.bf16.mxu0 %v5103_v26  ;;  %3203 = vmatprep.mubr.bf16.mxu1 %v5103_v26 }
 0x20a   :  { %2818 = vmatmul.mubr.bf16.gmra.mrb[92].mxu0 %v5101_v22  ;;  %3204 = vmatmul.mubr.bf16.gmra.mrb[92].mxu1 %v5101_v22 }
 0x20b   :  { %2827 = vmatprep.mubr.bf16.mxu0 %v5107_v39  ;;  %3213 = vmatprep.mubr.bf16.mxu1 %v5107_v39 }
 0x212   :  { %2828 = vmatmul.mubr.bf16.gmra.mrb[96].mxu0 %v5105_v37  ;;  %3214 = vmatmul.mubr.bf16.gmra.mrb[96].mxu1 %v5105_v37 }
 0x213   :  { %2837 = vmatprep.mubr.bf16.mxu0 %v5111_v55  ;;  %3223 = vmatprep.mubr.bf16.mxu1 %v5111_v55 }
 0x21a   :  { %2838 = vmatmul.mubr.bf16.gmra.mrb[100].mxu0 %v5109_v53  ;;  %3224 = vmatmul.mubr.bf16.gmra.mrb[100].mxu1 %v5109_v53 }
 0x21b   :  { %2847 = vmatprep.mubr.bf16.mxu0 %v5115_v7  ;;  %3233 = vmatprep.mubr.bf16.mxu1 %v5115_v7 }
 0x222   :  { %2848 = vmatmul.mubr.bf16.gmra.mrb[104].mxu0 %v5113_v5  ;;  %3234 = vmatmul.mubr.bf16.gmra.mrb[104].mxu1 %v5113_v5 }
 0x223   :  { %2857 = vmatprep.mubr.bf16.mxu0 %v5119_v24  ;;  %3243 = vmatprep.mubr.bf16.mxu1 %v5119_v24 }
 0x22a   :  { %2858 = vmatmul.mubr.bf16.gmra.mrb[108].mxu0 %v5117_v19  ;;  %3244 = vmatmul.mubr.bf16.gmra.mrb[108].mxu1 %v5117_v19 }
 0x22b   :  { %2867 = vmatprep.mubr.bf16.mxu0 %v5123_v41  ;;  %3253 = vmatprep.mubr.bf16.mxu1 %v5123_v41 }
 0x232   :  { %2868 = vmatmul.mubr.bf16.gmra.mrb[112].mxu0 %v5121_v38  ;;  %3254 = vmatmul.mubr.bf16.gmra.mrb[112].mxu1 %v5121_v38 }
 0x233   :  { %2877 = vmatprep.mubr.bf16.mxu0 %v1723_v51  ;;  %3263 = vmatprep.mubr.bf16.mxu1 %v1723_v51 }
 0x23a   :  { %2878 = vmatmul.mubr.bf16.gmra.mrb[116].mxu0 %v5127_v49  ;;  %3264 = vmatmul.mubr.bf16.gmra.mrb[116].mxu1 %v5127_v49 }
 0x23b   :  { %2887 = vmatprep.mubr.bf16.mxu0 %v1727_v58  ;;  %3273 = vmatprep.mubr.bf16.mxu1 %v1727_v58 }
 0x242   :  { %2888 = vmatmul.mubr.bf16.gmra.mrb[120].mxu0 %v1726_v57  ;;  %3274 = vmatmul.mubr.bf16.gmra.mrb[120].mxu1 %v1726_v57 }
 0x243   :  { %2897 = vmatprep.mubr.bf16.mxu0 %v1731_v47  ;;  %3283 = vmatprep.mubr.bf16.mxu1 %v1731_v47 }
 0x24a   :  { %2898 = vmatmul.mubr.bf16.gmra.mrb[124].mxu0 %v1730_v63  ;;  %3284 = vmatmul.mubr.bf16.gmra.mrb[124].mxu1 %v1730_v63 }
 0x2a5   :  { %v2749_v22 = vpop.f32.mrb[64].mxu0  ;;  %v3135_v26 = vpop.f32.mrb[64].mxu1 }
 0x2a6   :  { %v4240_v37 = vadd.f32 %v2749_v22, %v5184_v59  ;;  %v4304_v39 = vadd.f32 %v3135_v26, %v5186_v61  ;;  %v2751_v53 = vpop.f32.mrb[65].mxu0  ;;  %v3137_v55 = vpop.f32.mrb[65].mxu1 }
 0x2a7   :  { %v4241_v2 = vadd.f32 %v2751_v53, %v5188_v9  ;;  %v4305_v4 = vadd.f32 %v3137_v55, %v5190_v11  ;;  %v2753_v5 = vpop.f32.mrb[66].mxu0  ;;  %v3139_v6 = vpop.f32.mrb[66].mxu1 }
 0x2a8   :  { %v3294_v7 = vmax.f32 %v4240_v37, 0.0  ;;  %v3296_v8 = vmax.f32 %v4304_v39, 0.0  ;;  %v4242_v10 = vadd.f32 %v2753_v5, %v5184_v59  ;;  %v4306_v12 = vadd.f32 %v3139_v6, %v5186_v61  ;;  %v2755_v13 = vpop.f32.mrb[67].mxu0  ;;  %v3141_v14 = vpop.f32.mrb[67].mxu1 }
 0x2a9   :  { %v3295_v15 = vmax.f32 %v4241_v2, 0.0  ;;  %v3297_v16 = vmax.f32 %v4305_v4, 0.0  ;;  %v4243_v17 = vadd.f32 %v2755_v13, %v5188_v9  ;;  %v4307_v18 = vadd.f32 %v3141_v14, %v5190_v11 }
 0x2aa   :  { %v3298_v19 = vmax.f32 %v4242_v10, 0.0  ;;  %v3300_v20 = vmax.f32 %v4306_v12, 0.0 }
 0x2ab   :  { %v4176_v24 = vpack.c.bf16 %v3295_v15, %v3294_v7  ;;  %v4177_v28 = vpack.c.bf16 %v3297_v16, %v3296_v8  ;;  %v3299_v29 = vmax.f32 %v4243_v17, 0.0  ;;  %v3301_v30 = vmax.f32 %v4307_v18, 0.0 }
 0x2ad   :  { %3806 = vst [vmem:[#allocation9] sm:$0xff] %v4176_v24  ;;  %3807 = vst [vmem:[#allocation9 + $0x8] sm:$0xff] %v4177_v28  ;;  %v4178_v31 = vpack.c.bf16 %v3299_v29, %v3298_v19  ;;  %v4179_v32 = vpack.c.bf16 %v3301_v30, %v3300_v20  ;;  %v2759_v33 = vpop.f32.mrb[68].mxu0  ;;  %v3145_v34 = vpop.f32.mrb[68].mxu1 }
 0x2ae   :  { %v4244_v35 = vadd.f32 %v2759_v33, %v5184_v59  ;;  %v4308_v36 = vadd.f32 %v3145_v34, %v5186_v61  ;;  %v2761_v38 = vpop.f32.mrb[69].mxu0  ;;  %v3147_v40 = vpop.f32.mrb[69].mxu1 }
 0x2af   :  { %3808 = vst [vmem:[#allocation9 + $0x10] sm:$0xff] %v4178_v31  ;;  %3809 = vst [vmem:[#allocation9 + $0x18] sm:$0xff] %v4179_v32  ;;  %v4245_v41 = vadd.f32 %v2761_v38, %v5188_v9  ;;  %v4309_v42 = vadd.f32 %v3147_v40, %v5190_v11  ;;  %v2763_v44 = vpop.f32.mrb[70].mxu0  ;;  %v3149_v48 = vpop.f32.mrb[70].mxu1 }
 0x2b0   :  { %v3302_v49 = vmax.f32 %v4244_v35, 0.0  ;;  %v3304_v50 = vmax.f32 %v4308_v36, 0.0  ;;  %v4246_v51 = vadd.f32 %v2763_v44, %v5184_v59  ;;  %v4310_v52 = vadd.f32 %v3149_v48, %v5186_v61  ;;  %v2765_v54 = vpop.f32.mrb[71].mxu0  ;;  %v3151_v56 = vpop.f32.mrb[71].mxu1 }
 0x2b1   :  { %v3303_v57 = vmax.f32 %v4245_v41, 0.0  ;;  %v3305_v27 = vmax.f32 %v4309_v42, 0.0  ;;  %v4247_v58 = vadd.f32 %v2765_v54, %v5188_v9  ;;  %v4311_v25 = vadd.f32 %v3151_v56, %v5190_v11 }
 0x2b2   :  { %v3306_v60 = vmax.f32 %v4246_v51, 0.0  ;;  %v3308_v62 = vmax.f32 %v4310_v52, 0.0 }
 0x2b3   :  { %v4180_v63 = vpack.c.bf16 %v3303_v57, %v3302_v49  ;;  %v4181_v0 = vpack.c.bf16 %v3305_v27, %v3304_v50  ;;  %v3307_v47 = vmax.f32 %v4247_v58, 0.0  ;;  %v3309_v45 = vmax.f32 %v4311_v25, 0.0 }
 0x2b5   :  { %3810 = vst [vmem:[#allocation9 + $0x20] sm:$0xff] %v4180_v63  ;;  %3811 = vst [vmem:[#allocation9 + $0x28] sm:$0xff] %v4181_v0  ;;  %v4182_v1 = vpack.c.bf16 %v3307_v47, %v3306_v60  ;;  %v4183_v3 = vpack.c.bf16 %v3309_v45, %v3308_v62  ;;  %v2769_v21 = vpop.f32.mrb[72].mxu0  ;;  %v3155_v23 = vpop.f32.mrb[72].mxu1 }
 0x2b6   :  { %v4248_v43 = vadd.f32 %v2769_v21, %v5184_v59  ;;  %v4312_v46 = vadd.f32 %v3155_v23, %v5186_v61  ;;  %v2771_v22 = vpop.f32.mrb[73].mxu0  ;;  %v3157_v26 = vpop.f32.mrb[73].mxu1 }
 0x2b7   :  { %3812 = vst [vmem:[#allocation9 + $0x30] sm:$0xff] %v4182_v1  ;;  %3813 = vst [vmem:[#allocation9 + $0x38] sm:$0xff] %v4183_v3  ;;  %v4249_v37 = vadd.f32 %v2771_v22, %v5188_v9  ;;  %v4313_v39 = vadd.f32 %v3157_v26, %v5190_v11  ;;  %v2773_v53 = vpop.f32.mrb[74].mxu0  ;;  %v3159_v55 = vpop.f32.mrb[74].mxu1 }
 0x2b8   :  { %v3310_v2 = vmax.f32 %v4248_v43, 0.0  ;;  %v3312_v4 = vmax.f32 %v4312_v46, 0.0  ;;  %v4250_v5 = vadd.f32 %v2773_v53, %v5184_v59  ;;  %v4314_v6 = vadd.f32 %v3159_v55, %v5186_v61  ;;  %v2775_v7 = vpop.f32.mrb[75].mxu0  ;;  %v3161_v8 = vpop.f32.mrb[75].mxu1 }
 0x2b9   :  { %v3311_v10 = vmax.f32 %v4249_v37, 0.0  ;;  %v3313_v12 = vmax.f32 %v4313_v39, 0.0  ;;  %v4251_v13 = vadd.f32 %v2775_v7, %v5188_v9  ;;  %v4315_v14 = vadd.f32 %v3161_v8, %v5190_v11 }
 0x2ba   :  { %v3314_v15 = vmax.f32 %v4250_v5, 0.0  ;;  %v3316_v16 = vmax.f32 %v4314_v6, 0.0 }
 0x2bb   :  { %v4184_v17 = vpack.c.bf16 %v3311_v10, %v3310_v2  ;;  %v4185_v18 = vpack.c.bf16 %v3313_v12, %v3312_v4  ;;  %v3315_v19 = vmax.f32 %v4251_v13, 0.0  ;;  %v3317_v20 = vmax.f32 %v4315_v14, 0.0 }
 0x2bd   :  { %3814 = vst [vmem:[#allocation9 + $0x40] sm:$0xff] %v4184_v17  ;;  %3815 = vst [vmem:[#allocation9 + $0x48] sm:$0xff] %v4185_v18  ;;  %v4186_v24 = vpack.c.bf16 %v3315_v19, %v3314_v15  ;;  %v4187_v28 = vpack.c.bf16 %v3317_v20, %v3316_v16  ;;  %v2779_v29 = vpop.f32.mrb[76].mxu0  ;;  %v3165_v30 = vpop.f32.mrb[76].mxu1 }
 0x2be   :  { %v4252_v31 = vadd.f32 %v2779_v29, %v5184_v59  ;;  %v4316_v32 = vadd.f32 %v3165_v30, %v5186_v61  ;;  %v2781_v33 = vpop.f32.mrb[77].mxu0  ;;  %v3167_v34 = vpop.f32.mrb[77].mxu1 }
 0x2bf   :  { %3816 = vst [vmem:[#allocation9 + $0x50] sm:$0xff] %v4186_v24  ;;  %3817 = vst [vmem:[#allocation9 + $0x58] sm:$0xff] %v4187_v28  ;;  %v4253_v35 = vadd.f32 %v2781_v33, %v5188_v9  ;;  %v4317_v36 = vadd.f32 %v3167_v34, %v5190_v11  ;;  %v2783_v38 = vpop.f32.mrb[78].mxu0  ;;  %v3169_v40 = vpop.f32.mrb[78].mxu1 }
 0x2c0   :  { %v3318_v41 = vmax.f32 %v4252_v31, 0.0  ;;  %v3320_v42 = vmax.f32 %v4316_v32, 0.0  ;;  %v4254_v44 = vadd.f32 %v2783_v38, %v5184_v59  ;;  %v4318_v48 = vadd.f32 %v3169_v40, %v5186_v61  ;;  %v2785_v49 = vpop.f32.mrb[79].mxu0  ;;  %v3171_v50 = vpop.f32.mrb[79].mxu1 }
 0x2c1   :  { %v3319_v51 = vmax.f32 %v4253_v35, 0.0  ;;  %v3321_v52 = vmax.f32 %v4317_v36, 0.0  ;;  %v4255_v54 = vadd.f32 %v2785_v49, %v5188_v9  ;;  %v4319_v56 = vadd.f32 %v3171_v50, %v5190_v11 }
 0x2c2   :  { %v3322_v57 = vmax.f32 %v4254_v44, 0.0  ;;  %v3324_v27 = vmax.f32 %v4318_v48, 0.0 }
 0x2c3   :  { %v4188_v58 = vpack.c.bf16 %v3319_v51, %v3318_v41  ;;  %v4189_v25 = vpack.c.bf16 %v3321_v52, %v3320_v42  ;;  %v3323_v60 = vmax.f32 %v4255_v54, 0.0  ;;  %v3325_v62 = vmax.f32 %v4319_v56, 0.0 }
 0x2c5   :  { %3818 = vst [vmem:[#allocation9 + $0x60] sm:$0xff] %v4188_v58  ;;  %3819 = vst [vmem:[#allocation9 + $0x68] sm:$0xff] %v4189_v25  ;;  %v4190_v63 = vpack.c.bf16 %v3323_v60, %v3322_v57  ;;  %v4191_v0 = vpack.c.bf16 %v3325_v62, %v3324_v27  ;;  %v2789_v47 = vpop.f32.mrb[80].mxu0  ;;  %v3175_v45 = vpop.f32.mrb[80].mxu1 }
 0x2c6   :  { %v4256_v1 = vadd.f32 %v2789_v47, %v5184_v59  ;;  %v4320_v3 = vadd.f32 %v3175_v45, %v5186_v61  ;;  %v2791_v21 = vpop.f32.mrb[81].mxu0  ;;  %v3177_v23 = vpop.f32.mrb[81].mxu1 }
 0x2c7   :  { %3820 = vst [vmem:[#allocation9 + $0x70] sm:$0xff] %v4190_v63  ;;  %3821 = vst [vmem:[#allocation9 + $0x78] sm:$0xff] %v4191_v0  ;;  %v4257_v43 = vadd.f32 %v2791_v21, %v5188_v9  ;;  %v4321_v46 = vadd.f32 %v3177_v23, %v5190_v11  ;;  %v2793_v22 = vpop.f32.mrb[82].mxu0  ;;  %v3179_v26 = vpop.f32.mrb[82].mxu1 }
 0x2c8   :  { %v3326_v37 = vmax.f32 %v4256_v1, 0.0  ;;  %v3328_v39 = vmax.f32 %v4320_v3, 0.0  ;;  %v4258_v53 = vadd.f32 %v2793_v22, %v5184_v59  ;;  %v4322_v55 = vadd.f32 %v3179_v26, %v5186_v61  ;;  %v2795_v2 = vpop.f32.mrb[83].mxu0  ;;  %v3181_v4 = vpop.f32.mrb[83].mxu1 }
 0x2c9   :  { %v3327_v5 = vmax.f32 %v4257_v43, 0.0  ;;  %v3329_v6 = vmax.f32 %v4321_v46, 0.0  ;;  %v4259_v7 = vadd.f32 %v2795_v2, %v5188_v9  ;;  %v4323_v8 = vadd.f32 %v3181_v4, %v5190_v11 }
 0x2ca   :  { %v3330_v10 = vmax.f32 %v4258_v53, 0.0  ;;  %v3332_v12 = vmax.f32 %v4322_v55, 0.0 }
 0x2cb   :  { %v4192_v13 = vpack.c.bf16 %v3327_v5, %v3326_v37  ;;  %v4193_v14 = vpack.c.bf16 %v3329_v6, %v3328_v39  ;;  %v3331_v15 = vmax.f32 %v4259_v7, 0.0  ;;  %v3333_v16 = vmax.f32 %v4323_v8, 0.0 }
 0x2cd   :  { %3822 = vst [vmem:[#allocation9 + $0x80] sm:$0xff] %v4192_v13  ;;  %3823 = vst [vmem:[#allocation9 + $0x88] sm:$0xff] %v4193_v14  ;;  %v4194_v17 = vpack.c.bf16 %v3331_v15, %v3330_v10  ;;  %v4195_v18 = vpack.c.bf16 %v3333_v16, %v3332_v12  ;;  %v2799_v19 = vpop.f32.mrb[84].mxu0  ;;  %v3185_v20 = vpop.f32.mrb[84].mxu1 }
 0x2ce   :  { %v4260_v24 = vadd.f32 %v2799_v19, %v5184_v59  ;;  %v4324_v28 = vadd.f32 %v3185_v20, %v5186_v61  ;;  %v2801_v29 = vpop.f32.mrb[85].mxu0  ;;  %v3187_v30 = vpop.f32.mrb[85].mxu1 }
 0x2cf   :  { %3824 = vst [vmem:[#allocation9 + $0x90] sm:$0xff] %v4194_v17  ;;  %3825 = vst [vmem:[#allocation9 + $0x98] sm:$0xff] %v4195_v18  ;;  %v4261_v31 = vadd.f32 %v2801_v29, %v5188_v9  ;;  %v4325_v32 = vadd.f32 %v3187_v30, %v5190_v11  ;;  %v2803_v33 = vpop.f32.mrb[86].mxu0  ;;  %v3189_v34 = vpop.f32.mrb[86].mxu1 }
 0x2d0   :  { %v3334_v35 = vmax.f32 %v4260_v24, 0.0  ;;  %v3336_v36 = vmax.f32 %v4324_v28, 0.0  ;;  %v4262_v38 = vadd.f32 %v2803_v33, %v5184_v59  ;;  %v4326_v40 = vadd.f32 %v3189_v34, %v5186_v61  ;;  %v2805_v41 = vpop.f32.mrb[87].mxu0  ;;  %v3191_v42 = vpop.f32.mrb[87].mxu1 }
 0x2d1   :  { %v3335_v44 = vmax.f32 %v4261_v31, 0.0  ;;  %v3337_v48 = vmax.f32 %v4325_v32, 0.0  ;;  %v4263_v49 = vadd.f32 %v2805_v41, %v5188_v9  ;;  %v4327_v50 = vadd.f32 %v3191_v42, %v5190_v11 }
 0x2d2   :  { %v3338_v51 = vmax.f32 %v4262_v38, 0.0  ;;  %v3340_v52 = vmax.f32 %v4326_v40, 0.0 }
 0x2d3   :  { %v4196_v54 = vpack.c.bf16 %v3335_v44, %v3334_v35  ;;  %v4197_v56 = vpack.c.bf16 %v3337_v48, %v3336_v36  ;;  %v3339_v57 = vmax.f32 %v4263_v49, 0.0  ;;  %v3341_v27 = vmax.f32 %v4327_v50, 0.0 }
 0x2d5   :  { %3826 = vst [vmem:[#allocation9 + $0xa0] sm:$0xff] %v4196_v54  ;;  %3827 = vst [vmem:[#allocation9 + $0xa8] sm:$0xff] %v4197_v56  ;;  %v4198_v58 = vpack.c.bf16 %v3339_v57, %v3338_v51  ;;  %v4199_v25 = vpack.c.bf16 %v3341_v27, %v3340_v52  ;;  %v2809_v60 = vpop.f32.mrb[88].mxu0  ;;  %v3195_v62 = vpop.f32.mrb[88].mxu1 }
 0x2d6   :  { %v4264_v63 = vadd.f32 %v2809_v60, %v5184_v59  ;;  %v4328_v0 = vadd.f32 %v3195_v62, %v5186_v61  ;;  %v2811_v47 = vpop.f32.mrb[89].mxu0  ;;  %v3197_v45 = vpop.f32.mrb[89].mxu1 }
 0x2d7   :  { %3828 = vst [vmem:[#allocation9 + $0xb0] sm:$0xff] %v4198_v58  ;;  %3829 = vst [vmem:[#allocation9 + $0xb8] sm:$0xff] %v4199_v25  ;;  %v4265_v1 = vadd.f32 %v2811_v47, %v5188_v9  ;;  %v4329_v3 = vadd.f32 %v3197_v45, %v5190_v11  ;;  %v2813_v21 = vpop.f32.mrb[90].mxu0  ;;  %v3199_v23 = vpop.f32.mrb[90].mxu1 }
 0x2d8   :  { %v3342_v43 = vmax.f32 %v4264_v63, 0.0  ;;  %v3344_v46 = vmax.f32 %v4328_v0, 0.0  ;;  %v4266_v22 = vadd.f32 %v2813_v21, %v5184_v59  ;;  %v4330_v26 = vadd.f32 %v3199_v23, %v5186_v61  ;;  %v2815_v37 = vpop.f32.mrb[91].mxu0  ;;  %v3201_v39 = vpop.f32.mrb[91].mxu1 }
 0x2d9   :  { %v3343_v53 = vmax.f32 %v4265_v1, 0.0  ;;  %v3345_v55 = vmax.f32 %v4329_v3, 0.0  ;;  %v4267_v2 = vadd.f32 %v2815_v37, %v5188_v9  ;;  %v4331_v4 = vadd.f32 %v3201_v39, %v5190_v11 }
 0x2da   :  { %v3346_v5 = vmax.f32 %v4266_v22, 0.0  ;;  %v3348_v6 = vmax.f32 %v4330_v26, 0.0 }
 0x2db   :  { %v4200_v7 = vpack.c.bf16 %v3343_v53, %v3342_v43  ;;  %v4201_v8 = vpack.c.bf16 %v3345_v55, %v3344_v46  ;;  %v3347_v10 = vmax.f32 %v4267_v2, 0.0  ;;  %v3349_v12 = vmax.f32 %v4331_v4, 0.0 }
 0x2dd   :  { %3830 = vst [vmem:[#allocation9 + $0xc0] sm:$0xff] %v4200_v7  ;;  %3831 = vst [vmem:[#allocation9 + $0xc8] sm:$0xff] %v4201_v8  ;;  %v4202_v13 = vpack.c.bf16 %v3347_v10, %v3346_v5  ;;  %v4203_v14 = vpack.c.bf16 %v3349_v12, %v3348_v6  ;;  %v2819_v15 = vpop.f32.mrb[92].mxu0  ;;  %v3205_v16 = vpop.f32.mrb[92].mxu1 }
 0x2de   :  { %v4268_v17 = vadd.f32 %v2819_v15, %v5184_v59  ;;  %v4332_v18 = vadd.f32 %v3205_v16, %v5186_v61  ;;  %v2821_v19 = vpop.f32.mrb[93].mxu0  ;;  %v3207_v20 = vpop.f32.mrb[93].mxu1 }
 0x2df   :  { %3832 = vst [vmem:[#allocation9 + $0xd0] sm:$0xff] %v4202_v13  ;;  %3833 = vst [vmem:[#allocation9 + $0xd8] sm:$0xff] %v4203_v14  ;;  %v4269_v24 = vadd.f32 %v2821_v19, %v5188_v9  ;;  %v4333_v28 = vadd.f32 %v3207_v20, %v5190_v11  ;;  %v2823_v29 = vpop.f32.mrb[94].mxu0  ;;  %v3209_v30 = vpop.f32.mrb[94].mxu1 }
 0x2e0   :  { %v3350_v31 = vmax.f32 %v4268_v17, 0.0  ;;  %v3352_v32 = vmax.f32 %v4332_v18, 0.0  ;;  %v4270_v33 = vadd.f32 %v2823_v29, %v5184_v59  ;;  %v4334_v34 = vadd.f32 %v3209_v30, %v5186_v61  ;;  %v2825_v35 = vpop.f32.mrb[95].mxu0  ;;  %v3211_v36 = vpop.f32.mrb[95].mxu1 }
 0x2e1   :  { %v3351_v38 = vmax.f32 %v4269_v24, 0.0  ;;  %v3353_v40 = vmax.f32 %v4333_v28, 0.0  ;;  %v4271_v41 = vadd.f32 %v2825_v35, %v5188_v9  ;;  %v4335_v42 = vadd.f32 %v3211_v36, %v5190_v11 }
 0x2e2   :  { %v3354_v44 = vmax.f32 %v4270_v33, 0.0  ;;  %v3356_v48 = vmax.f32 %v4334_v34, 0.0 }
 0x2e3   :  { %v4204_v49 = vpack.c.bf16 %v3351_v38, %v3350_v31  ;;  %v4205_v50 = vpack.c.bf16 %v3353_v40, %v3352_v32  ;;  %v3355_v51 = vmax.f32 %v4271_v41, 0.0  ;;  %v3357_v52 = vmax.f32 %v4335_v42, 0.0 }
 0x2e5   :  { %3834 = vst [vmem:[#allocation9 + $0xe0] sm:$0xff] %v4204_v49  ;;  %3835 = vst [vmem:[#allocation9 + $0xe8] sm:$0xff] %v4205_v50  ;;  %v4206_v54 = vpack.c.bf16 %v3355_v51, %v3354_v44  ;;  %v4207_v56 = vpack.c.bf16 %v3357_v52, %v3356_v48  ;;  %v2829_v57 = vpop.f32.mrb[96].mxu0  ;;  %v3215_v27 = vpop.f32.mrb[96].mxu1 }
 0x2e6   :  { %v4272_v58 = vadd.f32 %v2829_v57, %v5184_v59  ;;  %v4336_v25 = vadd.f32 %v3215_v27, %v5186_v61  ;;  %v2831_v60 = vpop.f32.mrb[97].mxu0  ;;  %v3217_v62 = vpop.f32.mrb[97].mxu1 }
 0x2e7   :  { %3836 = vst [vmem:[#allocation9 + $0xf0] sm:$0xff] %v4206_v54  ;;  %3837 = vst [vmem:[#allocation9 + $0xf8] sm:$0xff] %v4207_v56  ;;  %v4273_v63 = vadd.f32 %v2831_v60, %v5188_v9  ;;  %v4337_v0 = vadd.f32 %v3217_v62, %v5190_v11  ;;  %v2833_v47 = vpop.f32.mrb[98].mxu0  ;;  %v3219_v45 = vpop.f32.mrb[98].mxu1 }
 0x2e8   :  { %v3358_v1 = vmax.f32 %v4272_v58, 0.0  ;;  %v3360_v3 = vmax.f32 %v4336_v25, 0.0  ;;  %v4274_v21 = vadd.f32 %v2833_v47, %v5184_v59  ;;  %v4338_v23 = vadd.f32 %v3219_v45, %v5186_v61  ;;  %v2835_v43 = vpop.f32.mrb[99].mxu0  ;;  %v3221_v46 = vpop.f32.mrb[99].mxu1 }
 0x2e9   :  { %v3359_v22 = vmax.f32 %v4273_v63, 0.0  ;;  %v3361_v26 = vmax.f32 %v4337_v0, 0.0  ;;  %v4275_v37 = vadd.f32 %v2835_v43, %v5188_v9  ;;  %v4339_v39 = vadd.f32 %v3221_v46, %v5190_v11 }
 0x2ea   :  { %v3362_v53 = vmax.f32 %v4274_v21, 0.0  ;;  %v3364_v55 = vmax.f32 %v4338_v23, 0.0 }
 0x2eb   :  { %v4208_v2 = vpack.c.bf16 %v3359_v22, %v3358_v1  ;;  %v4209_v4 = vpack.c.bf16 %v3361_v26, %v3360_v3  ;;  %v3363_v5 = vmax.f32 %v4275_v37, 0.0  ;;  %v3365_v6 = vmax.f32 %v4339_v39, 0.0 }
 0x2ed   :  { %3838 = vst [vmem:[#allocation9 + $0x100] sm:$0xff] %v4208_v2  ;;  %3839 = vst [vmem:[#allocation9 + $0x108] sm:$0xff] %v4209_v4  ;;  %v4210_v7 = vpack.c.bf16 %v3363_v5, %v3362_v53  ;;  %v4211_v8 = vpack.c.bf16 %v3365_v6, %v3364_v55  ;;  %v2839_v10 = vpop.f32.mrb[100].mxu0  ;;  %v3225_v12 = vpop.f32.mrb[100].mxu1 }
 0x2ee   :  { %v4276_v13 = vadd.f32 %v2839_v10, %v5184_v59  ;;  %v4340_v14 = vadd.f32 %v3225_v12, %v5186_v61  ;;  %v2841_v15 = vpop.f32.mrb[101].mxu0  ;;  %v3227_v16 = vpop.f32.mrb[101].mxu1 }
 0x2ef   :  { %3840 = vst [vmem:[#allocation9 + $0x110] sm:$0xff] %v4210_v7  ;;  %3841 = vst [vmem:[#allocation9 + $0x118] sm:$0xff] %v4211_v8  ;;  %v4277_v17 = vadd.f32 %v2841_v15, %v5188_v9  ;;  %v4341_v18 = vadd.f32 %v3227_v16, %v5190_v11  ;;  %v2843_v19 = vpop.f32.mrb[102].mxu0  ;;  %v3229_v20 = vpop.f32.mrb[102].mxu1 }
 0x2f0   :  { %v3366_v24 = vmax.f32 %v4276_v13, 0.0  ;;  %v3368_v28 = vmax.f32 %v4340_v14, 0.0  ;;  %v4278_v29 = vadd.f32 %v2843_v19, %v5184_v59  ;;  %v4342_v30 = vadd.f32 %v3229_v20, %v5186_v61  ;;  %v2845_v31 = vpop.f32.mrb[103].mxu0  ;;  %v3231_v32 = vpop.f32.mrb[103].mxu1 }
 0x2f1   :  { %v3367_v33 = vmax.f32 %v4277_v17, 0.0  ;;  %v3369_v34 = vmax.f32 %v4341_v18, 0.0  ;;  %v4279_v35 = vadd.f32 %v2845_v31, %v5188_v9  ;;  %v4343_v36 = vadd.f32 %v3231_v32, %v5190_v11 }
 0x2f2   :  { %v3370_v38 = vmax.f32 %v4278_v29, 0.0  ;;  %v3372_v40 = vmax.f32 %v4342_v30, 0.0 }
 0x2f3   :  { %v4212_v41 = vpack.c.bf16 %v3367_v33, %v3366_v24  ;;  %v4213_v42 = vpack.c.bf16 %v3369_v34, %v3368_v28  ;;  %v3371_v44 = vmax.f32 %v4279_v35, 0.0  ;;  %v3373_v48 = vmax.f32 %v4343_v36, 0.0 }
 0x2f5   :  { %3842 = vst [vmem:[#allocation9 + $0x120] sm:$0xff] %v4212_v41  ;;  %3843 = vst [vmem:[#allocation9 + $0x128] sm:$0xff] %v4213_v42  ;;  %v4214_v49 = vpack.c.bf16 %v3371_v44, %v3370_v38  ;;  %v4215_v50 = vpack.c.bf16 %v3373_v48, %v3372_v40  ;;  %v2849_v51 = vpop.f32.mrb[104].mxu0  ;;  %v3235_v52 = vpop.f32.mrb[104].mxu1 }
 0x2f6   :  { %v4280_v54 = vadd.f32 %v2849_v51, %v5184_v59  ;;  %v4344_v56 = vadd.f32 %v3235_v52, %v5186_v61  ;;  %v2851_v57 = vpop.f32.mrb[105].mxu0  ;;  %v3237_v27 = vpop.f32.mrb[105].mxu1 }
 0x2f7   :  { %3844 = vst [vmem:[#allocation9 + $0x130] sm:$0xff] %v4214_v49  ;;  %3845 = vst [vmem:[#allocation9 + $0x138] sm:$0xff] %v4215_v50  ;;  %v4281_v58 = vadd.f32 %v2851_v57, %v5188_v9  ;;  %v4345_v25 = vadd.f32 %v3237_v27, %v5190_v11  ;;  %v2853_v60 = vpop.f32.mrb[106].mxu0  ;;  %v3239_v62 = vpop.f32.mrb[106].mxu1 }
 0x2f8   :  { %v3374_v63 = vmax.f32 %v4280_v54, 0.0  ;;  %v3376_v0 = vmax.f32 %v4344_v56, 0.0  ;;  %v4282_v47 = vadd.f32 %v2853_v60, %v5184_v59  ;;  %v4346_v45 = vadd.f32 %v3239_v62, %v5186_v61  ;;  %v2855_v1 = vpop.f32.mrb[107].mxu0  ;;  %v3241_v3 = vpop.f32.mrb[107].mxu1 }
 0x2f9   :  { %v3375_v21 = vmax.f32 %v4281_v58, 0.0  ;;  %v3377_v23 = vmax.f32 %v4345_v25, 0.0  ;;  %v4283_v43 = vadd.f32 %v2855_v1, %v5188_v9  ;;  %v4347_v46 = vadd.f32 %v3241_v3, %v5190_v11 }
 0x2fa   :  { %v3378_v22 = vmax.f32 %v4282_v47, 0.0  ;;  %v3380_v26 = vmax.f32 %v4346_v45, 0.0 }
 0x2fb   :  { %v4216_v37 = vpack.c.bf16 %v3375_v21, %v3374_v63  ;;  %v4217_v39 = vpack.c.bf16 %v3377_v23, %v3376_v0  ;;  %v3379_v53 = vmax.f32 %v4283_v43, 0.0  ;;  %v3381_v55 = vmax.f32 %v4347_v46, 0.0 }
 0x2fd   :  { %3846 = vst [vmem:[#allocation9 + $0x140] sm:$0xff] %v4216_v37  ;;  %3847 = vst [vmem:[#allocation9 + $0x148] sm:$0xff] %v4217_v39  ;;  %v4218_v2 = vpack.c.bf16 %v3379_v53, %v3378_v22  ;;  %v4219_v4 = vpack.c.bf16 %v3381_v55, %v3380_v26  ;;  %v2859_v5 = vpop.f32.mrb[108].mxu0  ;;  %v3245_v6 = vpop.f32.mrb[108].mxu1 }
 0x2fe   :  { %v4284_v7 = vadd.f32 %v2859_v5, %v5184_v59  ;;  %v4348_v8 = vadd.f32 %v3245_v6, %v5186_v61  ;;  %v2861_v10 = vpop.f32.mrb[109].mxu0  ;;  %v3247_v12 = vpop.f32.mrb[109].mxu1 }
 0x2ff   :  { %3848 = vst [vmem:[#allocation9 + $0x150] sm:$0xff] %v4218_v2  ;;  %3849 = vst [vmem:[#allocation9 + $0x158] sm:$0xff] %v4219_v4  ;;  %v4285_v13 = vadd.f32 %v2861_v10, %v5188_v9  ;;  %v4349_v14 = vadd.f32 %v3247_v12, %v5190_v11  ;;  %v2863_v15 = vpop.f32.mrb[110].mxu0  ;;  %v3249_v16 = vpop.f32.mrb[110].mxu1 }
 0x300   :  { %v3382_v17 = vmax.f32 %v4284_v7, 0.0  ;;  %v3384_v18 = vmax.f32 %v4348_v8, 0.0  ;;  %v4286_v19 = vadd.f32 %v2863_v15, %v5184_v59  ;;  %v4350_v20 = vadd.f32 %v3249_v16, %v5186_v61  ;;  %v2865_v24 = vpop.f32.mrb[111].mxu0  ;;  %v3251_v28 = vpop.f32.mrb[111].mxu1 }
 0x301   :  { %v3383_v29 = vmax.f32 %v4285_v13, 0.0  ;;  %v3385_v30 = vmax.f32 %v4349_v14, 0.0  ;;  %v4287_v31 = vadd.f32 %v2865_v24, %v5188_v9  ;;  %v4351_v32 = vadd.f32 %v3251_v28, %v5190_v11 }
 0x302   :  { %v3386_v33 = vmax.f32 %v4286_v19, 0.0  ;;  %v3388_v34 = vmax.f32 %v4350_v20, 0.0 }
 0x303   :  { %v4220_v35 = vpack.c.bf16 %v3383_v29, %v3382_v17  ;;  %v4221_v36 = vpack.c.bf16 %v3385_v30, %v3384_v18  ;;  %v3387_v38 = vmax.f32 %v4287_v31, 0.0  ;;  %v3389_v40 = vmax.f32 %v4351_v32, 0.0 }
 0x305   :  { %3850 = vst [vmem:[#allocation9 + $0x160] sm:$0xff] %v4220_v35  ;;  %3851 = vst [vmem:[#allocation9 + $0x168] sm:$0xff] %v4221_v36  ;;  %v4222_v41 = vpack.c.bf16 %v3387_v38, %v3386_v33  ;;  %v4223_v42 = vpack.c.bf16 %v3389_v40, %v3388_v34  ;;  %v2869_v44 = vpop.f32.mrb[112].mxu0  ;;  %v3255_v48 = vpop.f32.mrb[112].mxu1 }
 0x306   :  { %v4288_v49 = vadd.f32 %v2869_v44, %v5184_v59  ;;  %v4352_v50 = vadd.f32 %v3255_v48, %v5186_v61  ;;  %v2871_v51 = vpop.f32.mrb[113].mxu0  ;;  %v3257_v52 = vpop.f32.mrb[113].mxu1 }
 0x307   :  { %3852 = vst [vmem:[#allocation9 + $0x170] sm:$0xff] %v4222_v41  ;;  %3853 = vst [vmem:[#allocation9 + $0x178] sm:$0xff] %v4223_v42  ;;  %v4289_v54 = vadd.f32 %v2871_v51, %v5188_v9  ;;  %v4353_v56 = vadd.f32 %v3257_v52, %v5190_v11  ;;  %v2873_v57 = vpop.f32.mrb[114].mxu0  ;;  %v3259_v27 = vpop.f32.mrb[114].mxu1 }
 0x308   :  { %v3390_v58 = vmax.f32 %v4288_v49, 0.0  ;;  %v3392_v25 = vmax.f32 %v4352_v50, 0.0  ;;  %v4290_v60 = vadd.f32 %v2873_v57, %v5184_v59  ;;  %v4354_v62 = vadd.f32 %v3259_v27, %v5186_v61  ;;  %v2875_v63 = vpop.f32.mrb[115].mxu0  ;;  %v3261_v0 = vpop.f32.mrb[115].mxu1 }
 0x309   :  { %v3391_v47 = vmax.f32 %v4289_v54, 0.0  ;;  %v3393_v45 = vmax.f32 %v4353_v56, 0.0  ;;  %v4291_v1 = vadd.f32 %v2875_v63, %v5188_v9  ;;  %v4355_v3 = vadd.f32 %v3261_v0, %v5190_v11 }
 0x30a   :  { %v3394_v21 = vmax.f32 %v4290_v60, 0.0  ;;  %v3396_v23 = vmax.f32 %v4354_v62, 0.0 }
 0x30b   :  { %v4224_v43 = vpack.c.bf16 %v3391_v47, %v3390_v58  ;;  %v4225_v46 = vpack.c.bf16 %v3393_v45, %v3392_v25  ;;  %v3395_v22 = vmax.f32 %v4291_v1, 0.0  ;;  %v3397_v26 = vmax.f32 %v4355_v3, 0.0 }
 0x30d   :  { %3854 = vst [vmem:[#allocation9 + $0x180] sm:$0xff] %v4224_v43  ;;  %3855 = vst [vmem:[#allocation9 + $0x188] sm:$0xff] %v4225_v46  ;;  %v4226_v37 = vpack.c.bf16 %v3395_v22, %v3394_v21  ;;  %v4227_v39 = vpack.c.bf16 %v3397_v26, %v3396_v23  ;;  %v2879_v53 = vpop.f32.mrb[116].mxu0  ;;  %v3265_v55 = vpop.f32.mrb[116].mxu1 }
 0x30e   :  { %v4292_v2 = vadd.f32 %v2879_v53, %v5184_v59  ;;  %v4356_v4 = vadd.f32 %v3265_v55, %v5186_v61  ;;  %v2881_v5 = vpop.f32.mrb[117].mxu0  ;;  %v3267_v6 = vpop.f32.mrb[117].mxu1 }
 0x30f   :  { %3856 = vst [vmem:[#allocation9 + $0x190] sm:$0xff] %v4226_v37  ;;  %3857 = vst [vmem:[#allocation9 + $0x198] sm:$0xff] %v4227_v39  ;;  %v4293_v7 = vadd.f32 %v2881_v5, %v5188_v9  ;;  %v4357_v8 = vadd.f32 %v3267_v6, %v5190_v11  ;;  %v2883_v10 = vpop.f32.mrb[118].mxu0  ;;  %v3269_v12 = vpop.f32.mrb[118].mxu1 }
 0x310   :  { %v3398_v13 = vmax.f32 %v4292_v2, 0.0  ;;  %v3400_v14 = vmax.f32 %v4356_v4, 0.0  ;;  %v4294_v15 = vadd.f32 %v2883_v10, %v5184_v59  ;;  %v4358_v16 = vadd.f32 %v3269_v12, %v5186_v61  ;;  %v2885_v17 = vpop.f32.mrb[119].mxu0  ;;  %v3271_v18 = vpop.f32.mrb[119].mxu1 }
 0x311   :  { %v3399_v19 = vmax.f32 %v4293_v7, 0.0  ;;  %v3401_v20 = vmax.f32 %v4357_v8, 0.0  ;;  %v4295_v24 = vadd.f32 %v2885_v17, %v5188_v9  ;;  %v4359_v28 = vadd.f32 %v3271_v18, %v5190_v11 }
 0x312   :  { %v3402_v29 = vmax.f32 %v4294_v15, 0.0  ;;  %v3404_v30 = vmax.f32 %v4358_v16, 0.0 }
 0x313   :  { %v4228_v31 = vpack.c.bf16 %v3399_v19, %v3398_v13  ;;  %v4229_v32 = vpack.c.bf16 %v3401_v20, %v3400_v14  ;;  %v3403_v33 = vmax.f32 %v4295_v24, 0.0  ;;  %v3405_v34 = vmax.f32 %v4359_v28, 0.0 }
 0x315   :  { %3858 = vst [vmem:[#allocation9 + $0x1a0] sm:$0xff] %v4228_v31  ;;  %3859 = vst [vmem:[#allocation9 + $0x1a8] sm:$0xff] %v4229_v32  ;;  %v4230_v35 = vpack.c.bf16 %v3403_v33, %v3402_v29  ;;  %v4231_v36 = vpack.c.bf16 %v3405_v34, %v3404_v30  ;;  %v2889_v38 = vpop.f32.mrb[120].mxu0  ;;  %v3275_v40 = vpop.f32.mrb[120].mxu1 }
 0x316   :  { %v4296_v41 = vadd.f32 %v2889_v38, %v5184_v59  ;;  %v4360_v42 = vadd.f32 %v3275_v40, %v5186_v61  ;;  %v2891_v44 = vpop.f32.mrb[121].mxu0  ;;  %v3277_v48 = vpop.f32.mrb[121].mxu1 }
 0x317   :  { %3860 = vst [vmem:[#allocation9 + $0x1b0] sm:$0xff] %v4230_v35  ;;  %3861 = vst [vmem:[#allocation9 + $0x1b8] sm:$0xff] %v4231_v36  ;;  %v4297_v49 = vadd.f32 %v2891_v44, %v5188_v9  ;;  %v4361_v50 = vadd.f32 %v3277_v48, %v5190_v11  ;;  %v2893_v51 = vpop.f32.mrb[122].mxu0  ;;  %v3279_v52 = vpop.f32.mrb[122].mxu1 }
 0x318   :  { %v3406_v54 = vmax.f32 %v4296_v41, 0.0  ;;  %v3408_v56 = vmax.f32 %v4360_v42, 0.0  ;;  %v4298_v57 = vadd.f32 %v2893_v51, %v5184_v59  ;;  %v4362_v27 = vadd.f32 %v3279_v52, %v5186_v61  ;;  %v2895_v58 = vpop.f32.mrb[123].mxu0  ;;  %v3281_v25 = vpop.f32.mrb[123].mxu1 }
 0x319   :  { %v3407_v60 = vmax.f32 %v4297_v49, 0.0  ;;  %v3409_v62 = vmax.f32 %v4361_v50, 0.0  ;;  %v4299_v63 = vadd.f32 %v2895_v58, %v5188_v9  ;;  %v4363_v0 = vadd.f32 %v3281_v25, %v5190_v11 }
 0x31a   :  { %v3410_v47 = vmax.f32 %v4298_v57, 0.0  ;;  %v3412_v45 = vmax.f32 %v4362_v27, 0.0 }
 0x31b   :  { %v4232_v1 = vpack.c.bf16 %v3407_v60, %v3406_v54  ;;  %v4233_v3 = vpack.c.bf16 %v3409_v62, %v3408_v56  ;;  %v3411_v21 = vmax.f32 %v4299_v63, 0.0  ;;  %v3413_v23 = vmax.f32 %v4363_v0, 0.0 }
 0x31d   :  { %3862 = vst [vmem:[#allocation9 + $0x1c0] sm:$0xff] %v4232_v1  ;;  %3863 = vst [vmem:[#allocation9 + $0x1c8] sm:$0xff] %v4233_v3  ;;  %v4234_v43 = vpack.c.bf16 %v3411_v21, %v3410_v47  ;;  %v4235_v46 = vpack.c.bf16 %v3413_v23, %v3412_v45  ;;  %v2899_v22 = vpop.f32.mrb[124].mxu0  ;;  %v3285_v26 = vpop.f32.mrb[124].mxu1 }
 0x31e   :  { %v4300_v37 = vadd.f32 %v2899_v22, %v5184_v59  ;;  %v4364_v39 = vadd.f32 %v3285_v26, %v5186_v61  ;;  %v2901_v53 = vpop.f32.mrb[125].mxu0  ;;  %v3287_v55 = vpop.f32.mrb[125].mxu1 }
 0x31f   :  { %3864 = vst [vmem:[#allocation9 + $0x1d0] sm:$0xff] %v4234_v43  ;;  %3865 = vst [vmem:[#allocation9 + $0x1d8] sm:$0xff] %v4235_v46  ;;  %v4301_v2 = vadd.f32 %v2901_v53, %v5188_v9  ;;  %v4365_v4 = vadd.f32 %v3287_v55, %v5190_v11  ;;  %v2903_v5 = vpop.f32.mrb[126].mxu0  ;;  %v3289_v6 = vpop.f32.mrb[126].mxu1 }
 0x320   :  { %v3414_v7 = vmax.f32 %v4300_v37, 0.0  ;;  %v3416_v8 = vmax.f32 %v4364_v39, 0.0  ;;  %v4302_v10 = vadd.f32 %v2903_v5, %v5184_v59  ;;  %v4366_v12 = vadd.f32 %v3289_v6, %v5186_v61  ;;  %v2905_v13 = vpop.f32.mrb[127].mxu0  ;;  %v3291_v14 = vpop.f32.mrb[127].mxu1 }
 0x321   :  { %v3415_v15 = vmax.f32 %v4301_v2, 0.0  ;;  %v3417_v16 = vmax.f32 %v4365_v4, 0.0  ;;  %v4303_v17 = vadd.f32 %v2905_v13, %v5188_v9  ;;  %v4367_v18 = vadd.f32 %v3291_v14, %v5190_v11 }
 0x322   :  { %v3418_v19 = vmax.f32 %v4302_v10, 0.0  ;;  %v3420_v20 = vmax.f32 %v4366_v12, 0.0 }
 0x323   :  { %v4236_v24 = vpack.c.bf16 %v3415_v15, %v3414_v7  ;;  %v4237_v28 = vpack.c.bf16 %v3417_v16, %v3416_v8  ;;  %v3419_v29 = vmax.f32 %v4303_v17, 0.0  ;;  %v3421_v30 = vmax.f32 %v4367_v18, 0.0 }
 0x325   :  { %3866 = vst [vmem:[#allocation9 + $0x1e0] sm:$0xff] %v4236_v24  ;;  %3867 = vst [vmem:[#allocation9 + $0x1e8] sm:$0xff] %v4237_v28  ;;  %v4238_v59 = vpack.c.bf16 %v3419_v29, %v3418_v19  ;;  %v4239_v61 = vpack.c.bf16 %v3421_v30, %v3420_v20 }
 0x327   :  { %3868 = vst [vmem:[#allocation9 + $0x1f0] sm:$0xff] %v4238_v59  ;;  %3869 = vst [vmem:[#allocation9 + $0x1f8] sm:$0xff] %v4239_v61 }
 0x328   :  { %4917 = shalt.err (!%p4914_p0)
}
 0x329   :  { %s4918_s8 = scalar_lea.hbm %s5339_s4, 8192 }
 0x32a   :  { %p4919_p1 = scmp.ne.s32.totalorder %s5339_s4, %s4918_s8  ;;  %p4922_p2 = scmp.lt.u32.totalorder %s4918_s8, %s5339_s4 }
 0x32c   :  { %p4924_p3 = pnand %p4922_p2, %p4919_p1 }
 0x32e   :  { %4927 = shalt.err (!%p4924_p3)
}
 0x32f   :  { %3881 = dma.vmem_to_hbm [thread:$0]  %s3876_s30, 8192, %s5339_s4, [#allocation5], %s4935_s25, %s4935_s25, %s4936_s26  }
 0x330   :  { %4932 = dma.done.wait [#allocation5], 8192  }
 0x331   :  { %4933 = vsyncadd [#allocation5], 4294959104 }
 0x332   :  { %3885 = vsyncpa [#allocation4], 1 }
 0x333   :  { %3886 = vsyncpa [#allocation7], 1 }
 0x334   :  { %3887 = vsyncpa [#allocation5], 1 }

</bundles_post_ra>
